<compile_context>
chip_gen: v7x
topology: tpu7x:2x2x1
jax: 0.10.0
libtpu: 0.0.40
codegen_flags: <defaults>
</compile_context>

<pallas_src>
import functools

import jax
import jax.numpy as jnp
import numpy as np
from jax import lax
from jax.experimental import pallas as pl
from jax.experimental.pallas import tpu as pltpu

EPS = 1e-5
_INV_SQRT2 = 0.7071067811865476
EDGE_TILE = 512   # edge rows per grid step (multiple of 8; >=256 fills v6e/v7x MXU)


def _gelu(x):
    # exact (erf-based) GELU, matching torch.nn.GELU(approximate='none')
    return 0.5 * x * (1.0 + lax.erf(x * _INV_SQRT2))


def _onehot(mask, dtype):
    # bool -> f32 is the well-trodden Mosaic path; optionally narrow to bf16
    m = mask.astype(jnp.float32)
    return m if dtype == jnp.float32 else m.astype(dtype)


def _mm(a, b, use_bf16):
    # MXU matmul with f32 accumulation; bf16 operands on the fast path.
    tgt = jnp.bfloat16 if use_bf16 else jnp.float32
    if a.dtype != tgt:
        a = a.astype(tgt)
    if b.dtype != tgt:
        b = b.astype(tgt)
    return jnp.dot(a, b, preferred_element_type=jnp.float32)


def _batchnorm(h, gamma, beta, n_rows):
    # nn.BatchNorm1d training mode (biased variance), two-pass form.
    inv_n = 1.0 / n_rows
    mean = jnp.sum(h, axis=0, keepdims=True) * inv_n
    d = h - mean
    var = jnp.sum(d * d, axis=0, keepdims=True) * inv_n
    return d * lax.rsqrt(var + EPS) * gamma + beta


# ------------------------- fused kernel: edges + aggr + ffn -------------------------
def conv_kernel(src_ref, dst_ref, x_ref, e_ref, bases_ref,
                w1_ref, b1_ref,
                w2_ref, b2_ref, g1_ref, be1_ref,
                w3_ref, b3_ref, g2_ref, be2_ref,
                o_ref, *, n_rows, use_bf16):
    k = pl.program_id(0)
    mxu_dt = jnp.bfloat16 if use_bf16 else jnp.float32

    # init: o_ref accumulates x_feat + aggr in place (no separate scratch buffer)
    @pl.when(k == 0)
    def _():
        o_ref[...] = x_ref[...].astype(jnp.float32)

    n = x_ref.shape[0]
    te = e_ref.shape[0]

    # gather x_feat[src[e]] for this edge tile via a one-hot MXU matmul
    # (0/1 weights are exact in bf16 as well; only int32 indices crossed HBM).
    src_col = src_ref[...]                                              # [TE, 1] i32
    gmask = lax.broadcasted_iota(jnp.int32, (te, n), 1) == src_col
    x_src = jnp.dot(_onehot(gmask, mxu_dt), x_ref[...].astype(mxu_dt),
                    preferred_element_type=jnp.float32)                 # [TE, H] f32

    # pre_ffn: GELU(Linear(x_src + e)) * bases
    pos_e = x_src + e_ref[...].astype(jnp.float32)
    h = _mm(pos_e, w1_ref[...], use_bf16) + b1_ref[...]
    v = _gelu(h) * bases_ref[...].astype(jnp.float32)                   # [TE, H] f32

    # segment-sum over destinations via one-hot scatter matmul on the MXU.
    # padded edges carry dst = -1 (never matches a node) -> dropped.
    dst_row = dst_ref[...]                                              # [1, TE] i32
    smask = lax.broadcasted_iota(jnp.int32, (n, te), 0) == dst_row
    o_ref[...] += jnp.dot(_onehot(smask, mxu_dt), v.astype(mxu_dt),
                          preferred_element_type=jnp.float32)           # [N, H]

    # epilogue: FFN + BatchNorm on the fully-resident x1 (no x1 HBM round trip)
    @pl.when(k == pl.num_programs(0) - 1)
    def _():
        x1 = o_ref[...]
        h1 = _mm(x1, w2_ref[...], use_bf16) + b2_ref[...]
        h1 = _gelu(_batchnorm(h1, g1_ref[...], be1_ref[...], n_rows))
        h2 = _mm(h1, w3_ref[...], use_bf16) + b3_ref[...]
        h2 = _gelu(_batchnorm(h2, g2_ref[...], be2_ref[...], n_rows))
        o_ref[...] = x1 + h2


# --------------------------------------- wrapper ------------------------------------
def conv_forward(x_feat, edge_attr, bases, src, dst, params, *,
                 use_bf16=False, edge_tile=EDGE_TILE):
    n, h = x_feat.shape
    e = edge_attr.shape[0]
    ep = ((e + edge_tile - 1) // edge_tile) * edge_tile
    n_tiles = ep // edge_tile
    f32 = jnp.float32
    stream_dt = jnp.bfloat16 if use_bf16 else f32

    # Big streams: row-pad only (no feature-dim padding -> no HBM blow-up);
    # in bf16 mode pre-cast so HBM bytes are halved and no per-step weight cast.
    x_in = x_feat.astype(stream_dt)
    e_in = jnp.pad(edge_attr.astype(stream_dt), ((0, ep - e), (0, 0)))
    ba_in = jnp.pad(bases.astype(stream_dt), ((0, ep - e), (0, 0)))
    src_col = jnp.pad(src.astype(jnp.int32), (0, ep - e)).reshape(ep, 1)
    dst_row = jnp.pad(dst.astype(jnp.int32), (0, ep - e),
                      constant_values=-1).reshape(1, ep)

    wcast = lambda a: a.astype(stream_dt)
    w1 = wcast(params["w1"]); w2 = wcast(params["w2"]); w3 = wcast(params["w3"])
    b1 = params["b1"].astype(f32); b2 = params["b2"].astype(f32)
    b3 = params["b3"].astype(f32)
    g1 = params["g1"].astype(f32); be1 = params["be1"].astype(f32)
    g2 = params["g2"].astype(f32); be2 = params["be2"].astype(f32)

    const = lambda k: (0, 0)
    isz = jnp.dtype(stream_dt).itemsize
    cost = pl.CostEstimate(
        flops=4 * ep * n * h + 2 * ep * h * h + 4 * n * h * h + 30 * (ep + n) * h,
        transcendentals=ep * h + 2 * n * h,
        bytes_accessed=isz * (2 * ep * h + n * h + 3 * h * h)
                       + 4 * (n * h + 8 * h) + 8 * ep)

    out = pl.pallas_call(
        functools.partial(conv_kernel, n_rows=n, use_bf16=use_bf16),
        out_shape=jax.ShapeDtypeStruct((n, h), f32),
        grid=(n_tiles,),
        in_specs=[
            pl.BlockSpec((edge_tile, 1), lambda k: (k, 0)),   # src indices tile
            pl.BlockSpec((1, edge_tile), lambda k: (0, k)),   # dst indices tile
            pl.BlockSpec((n, h), const),                      # x_feat (resident)
            pl.BlockSpec((edge_tile, h), lambda k: (k, 0)),   # edge_attr tile
            pl.BlockSpec((edge_tile, h), lambda k: (k, 0)),   # bases tile
            pl.BlockSpec((h, h), const),                      # w1 (resident)
            pl.BlockSpec((1, h), const),                      # b1
            pl.BlockSpec((h, h), const),                      # w2
            pl.BlockSpec((1, h), const),                      # b2
            pl.BlockSpec((1, h), const),                      # g1
            pl.BlockSpec((1, h), const),                      # be1
            pl.BlockSpec((h, h), const),                      # w3
            pl.BlockSpec((1, h), const),                      # b3
            pl.BlockSpec((1, h), const),                      # g2
            pl.BlockSpec((1, h), const),                      # be2
        ],
        out_specs=pl.BlockSpec((n, h), const),
        compiler_params=pltpu.CompilerParams(
            dimension_semantics=("arbitrary",)),   # edge axis is a reduction
        cost_estimate=cost,
    )(src_col, dst_row, x_in, e_in, ba_in,
      w1, b1, w2, b2, g1, be1, w3, b3, g2, be2)
    return out


# --------------------------------------- reference ----------------------------------
def _batchnorm_ref(h, gamma, beta):
    mean = jnp.mean(h, axis=0, keepdims=True)
    var = jnp.mean((h - mean) * (h - mean), axis=0, keepdims=True)
    return (h - mean) * lax.rsqrt(var + EPS) * gamma + beta


def conv_reference(x_feat, edge_attr, bases, src, dst, params):
    n = x_feat.shape[0]
    pos_e = x_feat[src] + edge_attr
    v = _gelu(pos_e @ params["w1"] + params["b1"]) * bases
    aggr = jax.ops.segment_sum(v, dst, num_segments=n)
    x1 = x_feat + aggr
    h1 = _gelu(_batchnorm_ref(x1 @ params["w2"] + params["b2"],
                              params["g1"], params["be1"]))
    h2 = _gelu(_batchnorm_ref(h1 @ params["w3"] + params["b3"],
                              params["g2"], params["be2"]))
    return x1 + h2


if __name__ == "__main__":
    key = jax.random.PRNGKey(0)
    N, E, H = 32, 1100, 32   # nodes, edges, hidden_size (E pads to 1536 -> 3 edge tiles)

    ks = jax.random.split(key, 16)
    x_feat = jax.random.normal(ks[0], (N, H), jnp.float32)
    edge_attr = jax.random.normal(ks[1], (E, H), jnp.float32)
    bases = jax.random.normal(ks[2], (E, H), jnp.float32)
    src = jax.random.randint(ks[3], (E,), 0, N)
    dst = jax.random.randint(ks[4], (E,), 0, N)

    scale = 1.0 / np.sqrt(H)
    params = {
        # pre_ffn: Linear(H, H)
        "w1": jax.random.uniform(ks[5], (H, H), jnp.float32, -scale, scale),
        "b1": jax.random.uniform(ks[6], (1, H), jnp.float32, -scale, scale),
        # ffn: Linear -> BN -> GELU -> Linear -> BN -> GELU
        "w2": jax.random.uniform(ks[7], (H, H), jnp.float32, -scale, scale),
        "b2": jax.random.uniform(ks[8], (1, H), jnp.float32, -scale, scale),
        "g1": jax.random.uniform(ks[9], (1, H), jnp.float32, 0.5, 1.5),
        "be1": jax.random.uniform(ks[10], (1, H), jnp.float32, -0.5, 0.5),
        "w3": jax.random.uniform(ks[11], (H, H), jnp.float32, -scale, scale),
        "b3": jax.random.uniform(ks[12], (1, H), jnp.float32, -scale, scale),
        "g2": jax.random.uniform(ks[13], (1, H), jnp.float32, 0.5, 1.5),
        "be2": jax.random.uniform(ks[14], (1, H), jnp.float32, -0.5, 0.5),
    }

    ref = jax.block_until_ready(
        conv_reference(x_feat, edge_attr, bases, src, dst, params))

    # default f32 path: faithful to the PyTorch f32 forward
    out = jax.block_until_ready(
        conv_forward(x_feat, edge_attr, bases, src, dst, params))
    np.testing.assert_allclose(np.asarray(out), np.asarray(ref), rtol=1e-4, atol=1e-4)

    # bf16 MXU fast path: bf16 operands / streams, f32 accumulation
    out_bf16 = jax.block_until_ready(
        conv_forward(x_feat, edge_attr, bases, src, dst, params, use_bf16=True))
    np.testing.assert_allclose(np.asarray(out_bf16), np.asarray(ref),
                               rtol=2.5e-1, atol=2.5e-1)

    print("KERNEL_OK")
</pallas_src>

<mosaic_0001>
module attributes {stable_mosaic.version = 11 : i64} {
  func.func @conv_kernel(%arg0: i32, %arg1: memref<512x1xi32, #tpu.memory_space<vmem>>, %arg2: memref<1x512xi32, #tpu.memory_space<vmem>>, %arg3: memref<32x32xf32, #tpu.memory_space<vmem>>, %arg4: memref<512x32xf32, #tpu.memory_space<vmem>>, %arg5: memref<512x32xf32, #tpu.memory_space<vmem>>, %arg6: memref<32x32xf32, #tpu.memory_space<vmem>>, %arg7: memref<1x32xf32, #tpu.memory_space<vmem>>, %arg8: memref<32x32xf32, #tpu.memory_space<vmem>>, %arg9: memref<1x32xf32, #tpu.memory_space<vmem>>, %arg10: memref<1x32xf32, #tpu.memory_space<vmem>>, %arg11: memref<1x32xf32, #tpu.memory_space<vmem>>, %arg12: memref<32x32xf32, #tpu.memory_space<vmem>>, %arg13: memref<1x32xf32, #tpu.memory_space<vmem>>, %arg14: memref<1x32xf32, #tpu.memory_space<vmem>>, %arg15: memref<1x32xf32, #tpu.memory_space<vmem>>, %arg16: memref<32x32xf32, #tpu.memory_space<vmem>>) attributes {dimension_semantics = [#tpu.dimension_semantics<arbitrary>], iteration_bounds = array<i64: 3>, scalar_prefetch = 0 : i64, scratch_operands = 0 : i64, tpu.core_type = #tpu.core_type<tc>, window_params = [{transform_indices = @transform_0, window_bounds = array<i64: 512, 1>}, {transform_indices = @transform_1, window_bounds = array<i64: 1, 512>}, {pipeline_mode = #tpu.pipeline_mode<synchronous>, transform_indices = @transform_2, window_bounds = array<i64: 32, 32>}, {transform_indices = @transform_3, window_bounds = array<i64: 512, 32>}, {transform_indices = @transform_4, window_bounds = array<i64: 512, 32>}, {pipeline_mode = #tpu.pipeline_mode<synchronous>, transform_indices = @transform_5, window_bounds = array<i64: 32, 32>}, {pipeline_mode = #tpu.pipeline_mode<synchronous>, transform_indices = @transform_6, window_bounds = array<i64: 1, 32>}, {pipeline_mode = #tpu.pipeline_mode<synchronous>, transform_indices = @transform_7, window_bounds = array<i64: 32, 32>}, {pipeline_mode = #tpu.pipeline_mode<synchronous>, transform_indices = @transform_8, window_bounds = array<i64: 1, 32>}, {pipeline_mode = #tpu.pipeline_mode<synchronous>, transform_indices = @transform_9, window_bounds = array<i64: 1, 32>}, {pipeline_mode = #tpu.pipeline_mode<synchronous>, transform_indices = @transform_10, window_bounds = array<i64: 1, 32>}, {pipeline_mode = #tpu.pipeline_mode<synchronous>, transform_indices = @transform_11, window_bounds = array<i64: 32, 32>}, {pipeline_mode = #tpu.pipeline_mode<synchronous>, transform_indices = @transform_12, window_bounds = array<i64: 1, 32>}, {pipeline_mode = #tpu.pipeline_mode<synchronous>, transform_indices = @transform_13, window_bounds = array<i64: 1, 32>}, {pipeline_mode = #tpu.pipeline_mode<synchronous>, transform_indices = @transform_14, window_bounds = array<i64: 1, 32>}, {pipeline_mode = #tpu.pipeline_mode<synchronous>, transform_indices = @transform_15, window_bounds = array<i64: 32, 32>}]} {
    %c0_i32 = arith.constant 0 : i32
    %0 = arith.cmpi eq, %arg0, %c0_i32 : i32
    %1 = arith.extui %0 : i1 to i32
    %c0_i32_0 = arith.constant 0 : i32
    %2 = arith.cmpi ne, %1, %c0_i32_0 : i32
    scf.if %2 {
      %c0_24 = arith.constant 0 : index
      %c0_25 = arith.constant 0 : index
      %41 = vector.load %arg3[%c0_24, %c0_25] : memref<32x32xf32, #tpu.memory_space<vmem>>, vector<32x32xf32>
      %c0_26 = arith.constant 0 : index
      %c0_27 = arith.constant 0 : index
      %42 = vector.load %arg16[%c0_26, %c0_27] : memref<32x32xf32, #tpu.memory_space<vmem>>, vector<32x32xf32>
      tpu.vector_store %arg16[%c0_26, %c0_27], %41 {strides = array<i32>} : memref<32x32xf32, #tpu.memory_space<vmem>>, vector<32x32xf32>,
    } else {
    }
    %c0 = arith.constant 0 : index
    %c0_1 = arith.constant 0 : index
    %3 = vector.load %arg1[%c0, %c0_1] : memref<512x1xi32, #tpu.memory_space<vmem>>, vector<512x1xi32>
    %4 = tpu.iota {dimensions = array<i32: 1>} : vector<512x32xi32>
    %5 = vector.broadcast %3 : vector<512x1xi32> to vector<512x32xi32>
    %6 = arith.cmpi eq, %4, %5 : vector<512x32xi32>
    %7 = arith.extui %6 : vector<512x32xi1> to vector<512x32xi32>
    %8 = arith.sitofp %7 : vector<512x32xi32> to vector<512x32xf32>
    %c0_2 = arith.constant 0 : index
    %c0_3 = arith.constant 0 : index
    %9 = vector.load %arg3[%c0_2, %c0_3] : memref<32x32xf32, #tpu.memory_space<vmem>>, vector<32x32xf32>
    %cst = arith.constant dense<0.000000e+00> : vector<512x32xf32>
    %10 = tpu.matmul %8, %9, %cst {dimension_numbers = #tpu.dot_dimension_numbers<[1], [0], [0], [1], [0, 0, 1, 1], [], []>} : vector<512x32xf32>, vector<32x32xf32>, vector<512x32xf32> -> vector<512x32xf32>
    %c0_4 = arith.constant 0 : index
    %c0_5 = arith.constant 0 : index
    %11 = vector.load %arg4[%c0_4, %c0_5] : memref<512x32xf32, #tpu.memory_space<vmem>>, vector<512x32xf32>
    %12 = arith.addf %10, %11 : vector<512x32xf32>
    %c0_6 = arith.constant 0 : index
    %c0_7 = arith.constant 0 : index
    %13 = vector.load %arg6[%c0_6, %c0_7] : memref<32x32xf32, #tpu.memory_space<vmem>>, vector<32x32xf32>
    %cst_8 = arith.constant dense<0.000000e+00> : vector<512x32xf32>
    %14 = tpu.matmul %12, %13, %cst_8 {dimension_numbers = #tpu.dot_dimension_numbers<[1], [0], [0], [1], [0, 0, 1, 1], [], []>} : vector<512x32xf32>, vector<32x32xf32>, vector<512x32xf32> -> vector<512x32xf32>
    %c0_9 = arith.constant 0 : index
    %c0_10 = arith.constant 0 : index
    %15 = vector.load %arg7[%c0_9, %c0_10] : memref<1x32xf32, #tpu.memory_space<vmem>>, vector<1x32xf32>
    %16 = vector.broadcast %15 : vector<1x32xf32> to vector<512x32xf32>
    %17 = arith.addf %14, %16 : vector<512x32xf32>
    %cst_11 = arith.constant 5.000000e-01 : f32
    %18 = vector.broadcast %cst_11 : f32 to vector<512x32xf32>
    %19 = arith.mulf %18, %17 : vector<512x32xf32>
    %cst_12 = arith.constant 0.707106769 : f32
    %20 = vector.broadcast %cst_12 : f32 to vector<512x32xf32>
    %21 = arith.mulf %17, %20 : vector<512x32xf32>
    %22 = math.erf %21 : vector<512x32xf32>
    %cst_13 = arith.constant 1.000000e+00 : f32
    %23 = vector.broadcast %cst_13 : f32 to vector<512x32xf32>
    %24 = arith.addf %23, %22 : vector<512x32xf32>
    %25 = arith.mulf %19, %24 : vector<512x32xf32>
    %c0_14 = arith.constant 0 : index
    %c0_15 = arith.constant 0 : index
    %26 = vector.load %arg5[%c0_14, %c0_15] : memref<512x32xf32, #tpu.memory_space<vmem>>, vector<512x32xf32>
    %27 = arith.mulf %25, %26 : vector<512x32xf32>
    %c0_16 = arith.constant 0 : index
    %c0_17 = arith.constant 0 : index
    %28 = vector.load %arg2[%c0_16, %c0_17] : memref<1x512xi32, #tpu.memory_space<vmem>>, vector<1x512xi32>
    %29 = tpu.iota {dimensions = array<i32: 0>} : vector<32x512xi32>
    %30 = vector.broadcast %28 : vector<1x512xi32> to vector<32x512xi32>
    %31 = arith.cmpi eq, %29, %30 : vector<32x512xi32>
    %c0_18 = arith.constant 0 : index
    %c0_19 = arith.constant 0 : index
    %32 = vector.load %arg16[%c0_18, %c0_19] : memref<32x32xf32, #tpu.memory_space<vmem>>, vector<32x32xf32>
    %33 = arith.extui %31 : vector<32x512xi1> to vector<32x512xi32>
    %34 = arith.sitofp %33 : vector<32x512xi32> to vector<32x512xf32>
    %cst_20 = arith.constant dense<0.000000e+00> : vector<32x32xf32>
    %35 = tpu.matmul %34, %27, %cst_20 {dimension_numbers = #tpu.dot_dimension_numbers<[1], [0], [0], [1], [0, 0, 1, 1], [], []>} : vector<32x512xf32>, vector<512x32xf32>, vector<32x32xf32> -> vector<32x32xf32>
    %36 = arith.addf %32, %35 : vector<32x32xf32>
    %c0_21 = arith.constant 0 : index
    %c0_22 = arith.constant 0 : index
    %37 = vector.load %arg16[%c0_21, %c0_22] : memref<32x32xf32, #tpu.memory_space<vmem>>, vector<32x32xf32>
    tpu.vector_store %arg16[%c0_21, %c0_22], %36 {strides = array<i32>} : memref<32x32xf32, #tpu.memory_space<vmem>>, vector<32x32xf32>,
    %c2_i32 = arith.constant 2 : i32
    %38 = arith.cmpi eq, %arg0, %c2_i32 : i32
    %39 = arith.extui %38 : i1 to i32
    %c0_i32_23 = arith.constant 0 : i32
    %40 = arith.cmpi ne, %39, %c0_i32_23 : i32
    scf.if %40 {
      %c0_24 = arith.constant 0 : index
      %c0_25 = arith.constant 0 : index
      %41 = vector.load %arg16[%c0_24, %c0_25] : memref<32x32xf32, #tpu.memory_space<vmem>>, vector<32x32xf32>
      %c0_26 = arith.constant 0 : index
      %c0_27 = arith.constant 0 : index
      %42 = vector.load %arg8[%c0_26, %c0_27] : memref<32x32xf32, #tpu.memory_space<vmem>>, vector<32x32xf32>
      %cst_28 = arith.constant dense<0.000000e+00> : vector<32x32xf32>
      %43 = tpu.matmul %41, %42, %cst_28 {dimension_numbers = #tpu.dot_dimension_numbers<[1], [0], [0], [1], [0, 0, 1, 1], [], []>} : vector<32x32xf32>, vector<32x32xf32>, vector<32x32xf32> -> vector<32x32xf32>
      %c0_29 = arith.constant 0 : index
      %c0_30 = arith.constant 0 : index
      %44 = vector.load %arg9[%c0_29, %c0_30] : memref<1x32xf32, #tpu.memory_space<vmem>>, vector<1x32xf32>
      %45 = vector.broadcast %44 : vector<1x32xf32> to vector<32x32xf32>
      %46 = arith.addf %43, %45 : vector<32x32xf32>
      %c0_31 = arith.constant 0 : index
      %c0_32 = arith.constant 0 : index
      %47 = vector.load %arg10[%c0_31, %c0_32] : memref<1x32xf32, #tpu.memory_space<vmem>>, vector<1x32xf32>
      %c0_33 = arith.constant 0 : index
      %c0_34 = arith.constant 0 : index
      %48 = vector.load %arg11[%c0_33, %c0_34] : memref<1x32xf32, #tpu.memory_space<vmem>>, vector<1x32xf32>
      %cst_35 = arith.constant dense<0.000000e+00> : vector<32xf32>
      %49 = vector.multi_reduction <add>, %46, %cst_35 [0] : vector<32x32xf32> to vector<32xf32>
      %50 = vector.shape_cast %49 : vector<32xf32> to vector<1x32xf32>
      %cst_36 = arith.constant 3.125000e-02 : f32
      %51 = vector.broadcast %cst_36 : f32 to vector<1x32xf32>
      %52 = arith.mulf %50, %51 : vector<1x32xf32>
      %53 = vector.broadcast %52 : vector<1x32xf32> to vector<32x32xf32>
      %54 = arith.subf %46, %53 : vector<32x32xf32>
      %55 = arith.mulf %54, %54 : vector<32x32xf32>
      %cst_37 = arith.constant dense<0.000000e+00> : vector<32xf32>
      %56 = vector.multi_reduction <add>, %55, %cst_37 [0] : vector<32x32xf32> to vector<32xf32>
      %57 = vector.shape_cast %56 : vector<32xf32> to vector<1x32xf32>
      %cst_38 = arith.constant 3.125000e-02 : f32
      %58 = vector.broadcast %cst_38 : f32 to vector<1x32xf32>
      %59 = arith.mulf %57, %58 : vector<1x32xf32>
      %cst_39 = arith.constant 9.99999974E-6 : f32
      %60 = vector.broadcast %cst_39 : f32 to vector<1x32xf32>
      %61 = arith.addf %59, %60 : vector<1x32xf32>
      %62 = math.rsqrt %61 : vector<1x32xf32>
      %63 = vector.broadcast %62 : vector<1x32xf32> to vector<32x32xf32>
      %64 = arith.mulf %54, %63 : vector<32x32xf32>
      %65 = vector.broadcast %47 : vector<1x32xf32> to vector<32x32xf32>
      %66 = arith.mulf %64, %65 : vector<32x32xf32>
      %67 = vector.broadcast %48 : vector<1x32xf32> to vector<32x32xf32>
      %68 = arith.addf %66, %67 : vector<32x32xf32>
      %cst_40 = arith.constant 5.000000e-01 : f32
      %69 = vector.broadcast %cst_40 : f32 to vector<32x32xf32>
      %70 = arith.mulf %69, %68 : vector<32x32xf32>
      %cst_41 = arith.constant 0.707106769 : f32
      %71 = vector.broadcast %cst_41 : f32 to vector<32x32xf32>
      %72 = arith.mulf %68, %71 : vector<32x32xf32>
      %73 = math.erf %72 : vector<32x32xf32>
      %cst_42 = arith.constant 1.000000e+00 : f32
      %74 = vector.broadcast %cst_42 : f32 to vector<32x32xf32>
      %75 = arith.addf %74, %73 : vector<32x32xf32>
      %76 = arith.mulf %70, %75 : vector<32x32xf32>
      %c0_43 = arith.constant 0 : index
      %c0_44 = arith.constant 0 : index
      %77 = vector.load %arg12[%c0_43, %c0_44] : memref<32x32xf32, #tpu.memory_space<vmem>>, vector<32x32xf32>
      %cst_45 = arith.constant dense<0.000000e+00> : vector<32x32xf32>
      %78 = tpu.matmul %76, %77, %cst_45 {dimension_numbers = #tpu.dot_dimension_numbers<[1], [0], [0], [1], [0, 0, 1, 1], [], []>} : vector<32x32xf32>, vector<32x32xf32>, vector<32x32xf32> -> vector<32x32xf32>
      %c0_46 = arith.constant 0 : index
      %c0_47 = arith.constant 0 : index
      %79 = vector.load %arg13[%c0_46, %c0_47] : memref<1x32xf32, #tpu.memory_space<vmem>>, vector<1x32xf32>
      %80 = vector.broadcast %79 : vector<1x32xf32> to vector<32x32xf32>
      %81 = arith.addf %78, %80 : vector<32x32xf32>
      %c0_48 = arith.constant 0 : index
      %c0_49 = arith.constant 0 : index
      %82 = vector.load %arg14[%c0_48, %c0_49] : memref<1x32xf32, #tpu.memory_space<vmem>>, vector<1x32xf32>
      %c0_50 = arith.constant 0 : index
      %c0_51 = arith.constant 0 : index
      %83 = vector.load %arg15[%c0_50, %c0_51] : memref<1x32xf32, #tpu.memory_space<vmem>>, vector<1x32xf32>
      %cst_52 = arith.constant dense<0.000000e+00> : vector<32xf32>
      %84 = vector.multi_reduction <add>, %81, %cst_52 [0] : vector<32x32xf32> to vector<32xf32>
      %85 = vector.shape_cast %84 : vector<32xf32> to vector<1x32xf32>
      %cst_53 = arith.constant 3.125000e-02 : f32
      %86 = vector.broadcast %cst_53 : f32 to vector<1x32xf32>
      %87 = arith.mulf %85, %86 : vector<1x32xf32>
      %88 = vector.broadcast %87 : vector<1x32xf32> to vector<32x32xf32>
      %89 = arith.subf %81, %88 : vector<32x32xf32>
      %90 = arith.mulf %89, %89 : vector<32x32xf32>
      %cst_54 = arith.constant dense<0.000000e+00> : vector<32xf32>
      %91 = vector.multi_reduction <add>, %90, %cst_54 [0] : vector<32x32xf32> to vector<32xf32>
      %92 = vector.shape_cast %91 : vector<32xf32> to vector<1x32xf32>
      %cst_55 = arith.constant 3.125000e-02 : f32
      %93 = vector.broadcast %cst_55 : f32 to vector<1x32xf32>
      %94 = arith.mulf %92, %93 : vector<1x32xf32>
      %cst_56 = arith.constant 9.99999974E-6 : f32
      %95 = vector.broadcast %cst_56 : f32 to vector<1x32xf32>
      %96 = arith.addf %94, %95 : vector<1x32xf32>
      %97 = math.rsqrt %96 : vector<1x32xf32>
      %98 = vector.broadcast %97 : vector<1x32xf32> to vector<32x32xf32>
      %99 = arith.mulf %89, %98 : vector<32x32xf32>
      %100 = vector.broadcast %82 : vector<1x32xf32> to vector<32x32xf32>
      %101 = arith.mulf %99, %100 : vector<32x32xf32>
      %102 = vector.broadcast %83 : vector<1x32xf32> to vector<32x32xf32>
      %103 = arith.addf %101, %102 : vector<32x32xf32>
      %cst_57 = arith.constant 5.000000e-01 : f32
      %104 = vector.broadcast %cst_57 : f32 to vector<32x32xf32>
      %105 = arith.mulf %104, %103 : vector<32x32xf32>
      %cst_58 = arith.constant 0.707106769 : f32
      %106 = vector.broadcast %cst_58 : f32 to vector<32x32xf32>
      %107 = arith.mulf %103, %106 : vector<32x32xf32>
      %108 = math.erf %107 : vector<32x32xf32>
      %cst_59 = arith.constant 1.000000e+00 : f32
      %109 = vector.broadcast %cst_59 : f32 to vector<32x32xf32>
      %110 = arith.addf %109, %108 : vector<32x32xf32>
      %111 = arith.mulf %105, %110 : vector<32x32xf32>
      %112 = arith.addf %41, %111 : vector<32x32xf32>
      %c0_60 = arith.constant 0 : index
      %c0_61 = arith.constant 0 : index
      %113 = vector.load %arg16[%c0_60, %c0_61] : memref<32x32xf32, #tpu.memory_space<vmem>>, vector<32x32xf32>
      tpu.vector_store %arg16[%c0_60, %c0_61], %112 {strides = array<i32>} : memref<32x32xf32, #tpu.memory_space<vmem>>, vector<32x32xf32>,
    } else {
    }
    return
  }
  func.func @transform_0(%arg0: i32) -> (i32, i32) {
    %c0_i32 = arith.constant 0 : i32
    %c0_i32_0 = arith.constant 0 : i32
    return %arg0, %c0_i32 : i32, i32
  }
  func.func @transform_1(%arg0: i32) -> (i32, i32) {
    %c0_i32 = arith.constant 0 : i32
    %c0_i32_0 = arith.constant 0 : i32
    return %c0_i32, %arg0 : i32, i32
  }
  func.func @transform_2(%arg0: i32) -> (i32, i32) {
    %c0_i32 = arith.constant 0 : i32
    %c0_i32_0 = arith.constant 0 : i32
    %c0_i32_1 = arith.constant 0 : i32
    return %c0_i32, %c0_i32_0 : i32, i32
  }
  func.func @transform_3(%arg0: i32) -> (i32, i32) {
    %c0_i32 = arith.constant 0 : i32
    %c0_i32_0 = arith.constant 0 : i32
    return %arg0, %c0_i32 : i32, i32
  }
  func.func @transform_4(%arg0: i32) -> (i32, i32) {
    %c0_i32 = arith.constant 0 : i32
    %c0_i32_0 = arith.constant 0 : i32
    return %arg0, %c0_i32 : i32, i32
  }
  func.func @transform_5(%arg0: i32) -> (i32, i32) {
    %c0_i32 = arith.constant 0 : i32
    %c0_i32_0 = arith.constant 0 : i32
    %c0_i32_1 = arith.constant 0 : i32
    return %c0_i32, %c0_i32_0 : i32, i32
  }
  func.func @transform_6(%arg0: i32) -> (i32, i32) {
    %c0_i32 = arith.constant 0 : i32
    %c0_i32_0 = arith.constant 0 : i32
    %c0_i32_1 = arith.constant 0 : i32
    return %c0_i32, %c0_i32_0 : i32, i32
  }
  func.func @transform_7(%arg0: i32) -> (i32, i32) {
    %c0_i32 = arith.constant 0 : i32
    %c0_i32_0 = arith.constant 0 : i32
    %c0_i32_1 = arith.constant 0 : i32
    return %c0_i32, %c0_i32_0 : i32, i32
  }
  func.func @transform_8(%arg0: i32) -> (i32, i32) {
    %c0_i32 = arith.constant 0 : i32
    %c0_i32_0 = arith.constant 0 : i32
    %c0_i32_1 = arith.constant 0 : i32
    return %c0_i32, %c0_i32_0 : i32, i32
  }
  func.func @transform_9(%arg0: i32) -> (i32, i32) {
    %c0_i32 = arith.constant 0 : i32
    %c0_i32_0 = arith.constant 0 : i32
    %c0_i32_1 = arith.constant 0 : i32
    return %c0_i32, %c0_i32_0 : i32, i32
  }
  func.func @transform_10(%arg0: i32) -> (i32, i32) {
    %c0_i32 = arith.constant 0 : i32
    %c0_i32_0 = arith.constant 0 : i32
    %c0_i32_1 = arith.constant 0 : i32
    return %c0_i32, %c0_i32_0 : i32, i32
  }
  func.func @transform_11(%arg0: i32) -> (i32, i32) {
    %c0_i32 = arith.constant 0 : i32
    %c0_i32_0 = arith.constant 0 : i32
    %c0_i32_1 = arith.constant 0 : i32
    return %c0_i32, %c0_i32_0 : i32, i32
  }
  func.func @transform_12(%arg0: i32) -> (i32, i32) {
    %c0_i32 = arith.constant 0 : i32
    %c0_i32_0 = arith.constant 0 : i32
    %c0_i32_1 = arith.constant 0 : i32
    return %c0_i32, %c0_i32_0 : i32, i32
  }
  func.func @transform_13(%arg0: i32) -> (i32, i32) {
    %c0_i32 = arith.constant 0 : i32
    %c0_i32_0 = arith.constant 0 : i32
    %c0_i32_1 = arith.constant 0 : i32
    return %c0_i32, %c0_i32_0 : i32, i32
  }
  func.func @transform_14(%arg0: i32) -> (i32, i32) {
    %c0_i32 = arith.constant 0 : i32
    %c0_i32_0 = arith.constant 0 : i32
    %c0_i32_1 = arith.constant 0 : i32
    return %c0_i32, %c0_i32_0 : i32, i32
  }
  func.func @transform_15(%arg0: i32) -> (i32, i32) {
    %c0_i32 = arith.constant 0 : i32
    %c0_i32_0 = arith.constant 0 : i32
    %c0_i32_1 = arith.constant 0 : i32
    return %c0_i32, %c0_i32_0 : i32, i32
  }
}

</mosaic_0001>

<bundles_post_ra>
// kernel: tpu_custom_call.1
= control target key start
LH: loop header
LB: loop body
LE: loop exit
PB: predicated region body
PF: predicated region fallthrough
CT: control target
= control target key end

     0   :  { %s5728_s0 = inlined_call_operand.vmem [shape: s32[1536,1], index: 0, kind: input, shape index: {}]   ;;  %s5729_s1 = inlined_call_operand.vmem [shape: s32[1,1536], index: 1, kind: input, shape index: {}]   ;;  %s5730_s2 = inlined_call_operand.vmem [shape: f32[32,32], index: 2, kind: input, shape index: {}]   ;;  %s5731_s3 = inlined_call_operand.vmem [shape: f32[1536,32], index: 3, kind: input, shape index: {}]   ;;  %s5732_s4 = inlined_call_operand.vmem [shape: f32[1536,32], index: 4, kind: input, shape index: {}]   ;;  %s5733_s5 = inlined_call_operand.vmem [shape: f32[32,32], index: 5, kind: input, shape index: {}]   ;;  %s5734_s6 = inlined_call_operand.vmem [shape: f32[1,32], index: 6, kind: input, shape index: {}]   ;;  %s5735_s7 = inlined_call_operand.vmem [shape: f32[32,32], index: 7, kind: input, shape index: {}]   ;;  %s5736_s8 = inlined_call_operand.vmem [shape: f32[1,32], index: 8, kind: input, shape index: {}]   ;;  %s5737_s9 = inlined_call_operand.vmem [shape: f32[1,32], index: 9, kind: input, shape index: {}]   ;;  %s5738_s10 = inlined_call_operand.vmem [shape: f32[1,32], index: 10, kind: input, shape index: {}]   ;;  %s5739_s11 = inlined_call_operand.vmem [shape: f32[32,32], index: 11, kind: input, shape index: {}]   ;;  %s5740_s12 = inlined_call_operand.vmem [shape: f32[1,32], index: 12, kind: input, shape index: {}]   ;;  %s5741_s13 = inlined_call_operand.vmem [shape: f32[1,32], index: 13, kind: input, shape index: {}]   ;;  %s5742_s14 = inlined_call_operand.vmem [shape: f32[1,32], index: 14, kind: input, shape index: {}]   ;;  %s5743_s15 = inlined_call_operand.hbm [shape: f32[32,32], index: 15, kind: output, shape index: {}]  }
   0x1   :  { %5746 = sst [smem:[#allocation6_spill]] %s5743_s15 }
   0x2   :  { %20 = vsyncpa [#allocation3], 0  ;;  %s4547_s18 = smov 0  }
   0x3 LB: > { %5747 = sst [smem:[#allocation5_spill]] %s4459_s18  ;;  %s4553_s19 = sadd.s32 4294967295, %s4459_s18   ;;  %s4459_s18 = sphi %s4547_s18, %s26_s18  }
   0x4   : > { %p3427_p0 = scmp.ge.s32.totalorder %s4459_s18, 1  ;;  %p466_p1 = scmp.lt.s32.totalorder %s4459_s18, 4 }
   0x6   : > { %p467_p2 = pnand %p3427_p0, %p466_p1 }
   0x7   : > { %s3428_s20 = sshll.u32 (!%p467_p2), %s4553_s19, 6  ;;  %s3430_s21 = sshll.u32 (!%p467_p2), %s4553_s19, 2 }
   0x8   : > { %470 = sbr.rel (%p467_p2) target bundleno = 1613 (0x64d), region = 80  ;;  %p524_p3 = scmp.lt.s32.totalorder (!%p467_p2), %s3428_s20, 191 }
   0x9   : > { %p530_p4 = scmp.lt.s32.totalorder (!%p467_p2), %s3430_s21, 11  ;;  %p3435_p5 = scmp.ne.s32.totalorder (!%p467_p2), %s4553_s19, 0 }
   0xf   : > { %s5751_s20 = smov (!%p524_p3, %s3428_s20), 191  ;;  %s5753_s21 = smov (!%p530_p4, %s3430_s21), 11 }
  0x10   : > { %s3429_s22 = sshll.u32 %s5751_s20, 3  ;;  %s532_s28 = scalar_lea.vmem %s5729_s1, %s5753_s21  ;;  %v550_v0 = vld [vmem:[%s5730_s2] sm:$0xff] (!%p3435_p5)  ;;  %vm554_vm0 = vcmask (!%p3435_p5), 261120   ;;  %v551_v1 = vld [vmem:[%s5730_s2 + $0x8] sm:$0xff] (!%p3435_p5)  ;;  %v552_v2 = vld [vmem:[%s5730_s2 + $0x10] sm:$0xff] (!%p3435_p5) }
  0x11   : > { %s4564_s25 = scalar_lea.vmem %s5728_s0, %s3429_s22  ;;  %s4573_s16 = scalar_lea.vmem %s5731_s3, %s3429_s22  ;;  %555 = vst.msk [vmem:[#allocation2] sm:$0xff] (!%p3435_p5), %vm554_vm0, %v550_v0  ;;  %556 = vst.msk [vmem:[#allocation2 + $0x8] sm:$0xff] (!%p3435_p5), %vm554_vm0, %v551_v1  ;;  %v553_v3 = vld [vmem:[%s5730_s2 + $0x18] sm:$0xff] (!%p3435_p5) }
  0x12   : > { %s4578_s15 = scalar_lea.vmem %s5732_s4, %s3429_s22  ;;  %549 = sbr.rel (%p3435_p5) target bundleno = 25 (0x19), region = 84  ;;  %557 = vst.msk [vmem:[#allocation2 + $0x10] sm:$0xff] (!%p3435_p5), %vm554_vm0, %v552_v2  ;;  %558 = vst.msk [vmem:[#allocation2 + $0x18] sm:$0xff] (!%p3435_p5), %vm554_vm0, %v553_v3 }
  0x19 PF: > { %v561_v4 = vld [vmem:[%s4564_s25 + $0x10] sm:$0xff]  ;;  %v559_v5 = vld [vmem:[%s4564_s25] sm:$0xff]  ;;  %v4461_v6 = vmov 0   ;;  %v562_v7 = vld [vmem:[%s4564_s25 + $0x18] sm:$0xff]  ;;  %vm1077_vm1 = vcmask 261120   ;;  %p3661_p6 = scmp.ne.s32.totalorder %s4553_s19, 2 }
  0x1a   : > { %4273 = vset.pattern.permute.xlu1 %v4461_v6  ;;  %4272 = vset.pattern.permute.xlu0 %v4461_v6  ;;  %v560_v8 = vld [vmem:[%s4564_s25 + $0x8] sm:$0xff]  ;;  %v563_v10 = vld [vmem:[%s4564_s25 + $0x20] sm:$0xff]  ;;  %v566_v11 = vld [vmem:[%s4564_s25 + $0x38] sm:$0xff] }
  0x1b   : > { %632 = vperm.xlu1 %4273, %v561_v4   ;;  %626 = vperm.xlu0 %4272, %v559_v5   ;;  %v564_v9 = vld [vmem:[%s4564_s25 + $0x28] sm:$0xff]  ;;  %v565_v12 = vld [vmem:[%s4564_s25 + $0x30] sm:$0xff]  ;;  %v567_v14 = vld [vmem:[%s4564_s25 + $0x40] sm:$0xff] }
  0x1c   : > { %v568_v13 = vld [vmem:[%s4564_s25 + $0x48] sm:$0xff]  ;;  %v570_v15 = vld [vmem:[%s4564_s25 + $0x58] sm:$0xff]  ;;  %v569_v16 = vld [vmem:[%s4564_s25 + $0x50] sm:$0xff] }
  0x1d   : > { %v1009_v17 = vld [vmem:[%s5730_s2] sm:$0xff]  ;;  %v1010_v18 = vld [vmem:[%s5730_s2 + $0x8] sm:$0xff]  ;;  %v1011_v20 = vld [vmem:[%s5730_s2 + $0x10] sm:$0xff] }
  0x1e   : > { %v4156_v19 = vpack.c.bf16 %v1010_v18, %v1009_v17  ;;  %v1012_v21 = vld [vmem:[%s5730_s2 + $0x18] sm:$0xff]  ;;  %v572_v22 = vld [vmem:[%s4564_s25 + $0x68] sm:$0xff]  ;;  %v571_v23 = vld [vmem:[%s4564_s25 + $0x60] sm:$0xff] }
  0x1f   : > { %635 = vperm.xlu1 %4273, %v562_v7   ;;  %629 = vperm.xlu0 %4272, %v560_v8   ;;  %v4160_v24 = vpack.c.bf16 %v1012_v21, %v1011_v20  ;;  %v574_v25 = vld [vmem:[%s4564_s25 + $0x78] sm:$0xff]  ;;  %v573_v26 = vld [vmem:[%s4564_s25 + $0x70] sm:$0xff]  ;;  %v576_v27 = vld [vmem:[%s4564_s25 + $0x88] sm:$0xff] }
  0x20   : > { %4157 = vmatprep.subr.bf16.mxu0 %v4156_v19  ;;  %v575_v28 = vld [vmem:[%s4564_s25 + $0x80] sm:$0xff]  ;;  %v578_v29 = vld [vmem:[%s4564_s25 + $0x98] sm:$0xff]  ;;  %v577_v30 = vld [vmem:[%s4564_s25 + $0x90] sm:$0xff] }
  0x21   : > { %4159 = vmatpush3.bf16.msra.mxu0 %v4156_v19  ;;  %v580_v31 = vld [vmem:[%s4564_s25 + $0xa8] sm:$0xff]  ;;  %v579_v32 = vld [vmem:[%s4564_s25 + $0xa0] sm:$0xff]  ;;  %v582_v33 = vld [vmem:[%s4564_s25 + $0xb8] sm:$0xff] }
  0x22   : > { %4161 = vmatprep.subr.bf16.mxu0 %v4160_v24  ;;  %v581_v34 = vld [vmem:[%s4564_s25 + $0xb0] sm:$0xff]  ;;  %v584_v35 = vld [vmem:[%s4564_s25 + $0xc8] sm:$0xff]  ;;  %v583_v36 = vld [vmem:[%s4564_s25 + $0xc0] sm:$0xff] }
  0x23   : > { %641 = vperm.xlu1 %4273, %v564_v9   ;;  %638 = vperm.xlu0 %4272, %v563_v10   ;;  %v586_v37 = vld [vmem:[%s4564_s25 + $0xd8] sm:$0xff]  ;;  %v585_v38 = vld [vmem:[%s4564_s25 + $0xd0] sm:$0xff]  ;;  %v588_v39 = vld [vmem:[%s4564_s25 + $0xe8] sm:$0xff]  ;;  %v623_v9 = vlaneseq }
  0x24   : > { %v587_v40 = vld [vmem:[%s4564_s25 + $0xe0] sm:$0xff]  ;;  %v590_v41 = vld [vmem:[%s4564_s25 + $0xf8] sm:$0xff]  ;;  %v589_v42 = vld [vmem:[%s4564_s25 + $0xf0] sm:$0xff] }
  0x25   : > { %4163 = vmatpush3.bf16.msra.mxu0 %v4160_v24  ;;  %v592_v43 = vld [vmem:[%s4564_s25 + $0x108] sm:$0xff]  ;;  %v591_v44 = vld [vmem:[%s4564_s25 + $0x100] sm:$0xff]  ;;  %v594_v45 = vld [vmem:[%s4564_s25 + $0x118] sm:$0xff] }
  0x26   : > { %v593_v46 = vld [vmem:[%s4564_s25 + $0x110] sm:$0xff]  ;;  %v596_v47 = vld [vmem:[%s4564_s25 + $0x128] sm:$0xff]  ;;  %v595_v48 = vld [vmem:[%s4564_s25 + $0x120] sm:$0xff] }
  0x27   : > { %647 = vperm.xlu1 %4273, %v566_v11   ;;  %644 = vperm.xlu0 %4272, %v565_v12   ;;  %v598_v49 = vld [vmem:[%s4564_s25 + $0x138] sm:$0xff]  ;;  %v597_v50 = vld [vmem:[%s4564_s25 + $0x130] sm:$0xff]  ;;  %v600_v51 = vld [vmem:[%s4564_s25 + $0x148] sm:$0xff]  ;;  %v4670_v12 = vand.u32 127, %v623_v9 }
  0x28   : > { %v599_v52 = vld [vmem:[%s4564_s25 + $0x140] sm:$0xff]  ;;  %v602_v53 = vld [vmem:[%s4564_s25 + $0x158] sm:$0xff]  ;;  %v601_v54 = vld [vmem:[%s4564_s25 + $0x150] sm:$0xff] }
  0x29   : > { %v604_v55 = vld [vmem:[%s4564_s25 + $0x168] sm:$0xff]  ;;  %v603_v56 = vld [vmem:[%s4564_s25 + $0x160] sm:$0xff]  ;;  %v606_v57 = vld [vmem:[%s4564_s25 + $0x178] sm:$0xff] }
  0x2a   : > { %v605_v58 = vld [vmem:[%s4564_s25 + $0x170] sm:$0xff]  ;;  %v608_v59 = vld [vmem:[%s4564_s25 + $0x188] sm:$0xff]  ;;  %v607_v60 = vld [vmem:[%s4564_s25 + $0x180] sm:$0xff] }
  0x2b   : > { %653 = vperm.xlu1 %4273, %v568_v13   ;;  %650 = vperm.xlu0 %4272, %v567_v14   ;;  %v610_v61 = vld [vmem:[%s4564_s25 + $0x198] sm:$0xff]  ;;  %v609_v62 = vld [vmem:[%s4564_s25 + $0x190] sm:$0xff]  ;;  %v612_v63 = vld [vmem:[%s4564_s25 + $0x1a8] sm:$0xff] }
  0x2c   : > { %v611_v0 = vld [vmem:[%s4564_s25 + $0x1a0] sm:$0xff]  ;;  %v614_v1 = vld [vmem:[%s4564_s25 + $0x1b8] sm:$0xff]  ;;  %v613_v2 = vld [vmem:[%s4564_s25 + $0x1b0] sm:$0xff] }
  0x2d   : > { %v616_v3 = vld [vmem:[%s4564_s25 + $0x1c8] sm:$0xff]  ;;  %v615_v4 = vld [vmem:[%s4564_s25 + $0x1c0] sm:$0xff]  ;;  %v618_v5 = vld [vmem:[%s4564_s25 + $0x1d8] sm:$0xff] }
  0x2e   : > { %v617_v6 = vld [vmem:[%s4564_s25 + $0x1d0] sm:$0xff]  ;;  %v620_v7 = vld [vmem:[%s4564_s25 + $0x1e8] sm:$0xff]  ;;  %v619_v8 = vld [vmem:[%s4564_s25 + $0x1e0] sm:$0xff] }
  0x2f   : > { %659 = vperm.xlu1 %4273, %v570_v15   ;;  %656 = vperm.xlu0 %4272, %v569_v16   ;;  %v622_v10 = vld [vmem:[%s4564_s25 + $0x1f8] sm:$0xff]  ;;  %v621_v11 = vld [vmem:[%s4564_s25 + $0x1f0] sm:$0xff]  ;;  %v4462_v15 = vmov 0.0   ;;  %v1655_v17 = vld [vmem:[%s5733_s5] sm:$0xff] }
  0x30   : > { %v1656_v18 = vld [vmem:[%s5733_s5 + $0x8] sm:$0xff] }
  0x31   : > { %v4164_v21 = vpack.c.bf16 %v1656_v18, %v1655_v17 }
  0x33   : > { %665 = vperm.xlu1 %4273, %v572_v22   ;;  %662 = vperm.xlu0 %4272, %v571_v23  }
  0x34   : > { %4165 = vmatprep.subr.bf16.mxu1 %v4164_v21 }
  0x35   : > { %4167 = vmatpush3.bf16.msra.mxu1 %v4164_v21 }
  0x37   : > { %671 = vperm.xlu1 %4273, %v574_v25   ;;  %668 = vperm.xlu0 %4272, %v573_v26  }
  0x3b   : > { %677 = vperm.xlu1 %4273, %v576_v27   ;;  %674 = vperm.xlu0 %4272, %v575_v28  }
  0x3f   : > { %683 = vperm.xlu1 %4273, %v578_v29   ;;  %680 = vperm.xlu0 %4272, %v577_v30  }
  0x43   : > { %689 = vperm.xlu1 %4273, %v580_v31   ;;  %686 = vperm.xlu0 %4272, %v579_v32  }
  0x47   : > { %695 = vperm.xlu1 %4273, %v582_v33   ;;  %692 = vperm.xlu0 %4272, %v581_v34  }
  0x4b   : > { %701 = vperm.xlu1 %4273, %v584_v35   ;;  %698 = vperm.xlu0 %4272, %v583_v36  }
  0x4f   : > { %707 = vperm.xlu1 %4273, %v586_v37   ;;  %704 = vperm.xlu0 %4272, %v585_v38  }
  0x53   : > { %713 = vperm.xlu1 %4273, %v588_v39   ;;  %710 = vperm.xlu0 %4272, %v587_v40  }
  0x57   : > { %719 = vperm.xlu1 %4273, %v590_v41   ;;  %716 = vperm.xlu0 %4272, %v589_v42  }
  0x5b   : > { %725 = vperm.xlu1 %4273, %v592_v43   ;;  %722 = vperm.xlu0 %4272, %v591_v44  }
  0x5f   : > { %731 = vperm.xlu1 %4273, %v594_v45   ;;  %728 = vperm.xlu0 %4272, %v593_v46  }
  0x63   : > { %737 = vperm.xlu1 %4273, %v596_v47   ;;  %734 = vperm.xlu0 %4272, %v595_v48  }
  0x67   : > { %743 = vperm.xlu1 %4273, %v598_v49   ;;  %740 = vperm.xlu0 %4272, %v597_v50  }
  0x6b   : > { %749 = vperm.xlu1 %4273, %v600_v51   ;;  %746 = vperm.xlu0 %4272, %v599_v52  }
  0x6f   : > { %755 = vperm.xlu1 %4273, %v602_v53   ;;  %752 = vperm.xlu0 %4272, %v601_v54  }
  0x73   : > { %761 = vperm.xlu1 %4273, %v604_v55   ;;  %758 = vperm.xlu0 %4272, %v603_v56  }
  0x77   : > { %767 = vperm.xlu1 %4273, %v606_v57   ;;  %764 = vperm.xlu0 %4272, %v605_v58  }
  0x7b   : > { %773 = vperm.xlu1 %4273, %v608_v59   ;;  %770 = vperm.xlu0 %4272, %v607_v60  }
  0x7f   : > { %779 = vperm.xlu1 %4273, %v610_v61   ;;  %776 = vperm.xlu0 %4272, %v609_v62  }
  0x83   : > { %785 = vperm.xlu1 %4273, %v612_v63   ;;  %782 = vperm.xlu0 %4272, %v611_v0  }
  0x87   : > { %791 = vperm.xlu1 %4273, %v614_v1   ;;  %788 = vperm.xlu0 %4272, %v613_v2  }
  0x8b   : > { %797 = vperm.xlu1 %4273, %v616_v3   ;;  %794 = vperm.xlu0 %4272, %v615_v4  }
  0x8f   : > { %803 = vperm.xlu1 %4273, %v618_v5   ;;  %800 = vperm.xlu0 %4272, %v617_v6  }
  0x93   : > { %809 = vperm.xlu1 %4273, %v620_v7   ;;  %806 = vperm.xlu0 %4272, %v619_v8  }
  0x97   : > { %815 = vperm.xlu1 %4273, %v622_v10   ;;  %812 = vperm.xlu0 %4272, %v621_v11  }
  0x9a   : > { %v633_v13 = vpop.permute.xlu1 %632  ;;  %v627_v14 = vpop.permute.xlu0 %626 }
  0x9b   : > { %vm817_vm2 = vcmp.eq.s32.totalorder %v4670_v12, %v627_v14  ;;  %vm819_vm3 = vcmp.eq.s32.totalorder %v4670_v12, %v633_v13 }
  0x9c   : > { %v3436_v16 = vsel %vm817_vm2, 1.0, %v4462_v15  ;;  %v3438_v22 = vsel %vm819_vm3, 1.0, %v4462_v15 }
  0x9d   : > { %3928 = vmatprep.mubr.msk.f32.mxu0 %vm1077_vm1, %v3436_v16 }
  0x9e   : > { %v636_v19 = vpop.permute.xlu1 %635  ;;  %v630_v20 = vpop.permute.xlu0 %629 }
  0x9f   : > { %vm818_vm4 = vcmp.eq.s32.totalorder %v4670_v12, %v630_v20  ;;  %vm820_vm5 = vcmp.eq.s32.totalorder %v4670_v12, %v636_v19 }
  0xa0   : > { %v3437_v23 = vsel %vm818_vm4, 1.0, %v4462_v15  ;;  %v3439_v26 = vsel %vm820_vm5, 1.0, %v4462_v15 }
  0xa1   : > { %3929 = vmatmul.mubr.msk.f32.vlgmr.msra.gmra.mrb[0].mxu0 %vm1077_vm1, %v3437_v23 }
  0xa2   : > { %v642_v24 = vpop.permute.xlu1 %641  ;;  %3931 = vmatprep.mubr.msk.f32.mxu0 %vm1077_vm1, %v3438_v22  ;;  %v639_v25 = vpop.permute.xlu0 %638 }
  0xa3   : > { %vm821_vm6 = vcmp.eq.s32.totalorder %v4670_v12, %v639_v25  ;;  %vm822_vm7 = vcmp.eq.s32.totalorder %v4670_v12, %v642_v24 }
  0xa4   : > { %v3440_v27 = vsel %vm821_vm6, 1.0, %v4462_v15  ;;  %v3441_v30 = vsel %vm822_vm7, 1.0, %v4462_v15 }
  0xa5   : > { %3932 = vmatmul.mubr.msk.f32.gmra.mrb[2].mxu0 %vm1077_vm1, %v3439_v26 }
  0xa6   : > { %v648_v28 = vpop.permute.xlu1 %647  ;;  %3934 = vmatprep.mubr.msk.f32.mxu0 %vm1077_vm1, %v3440_v27  ;;  %v645_v29 = vpop.permute.xlu0 %644 }
  0xa7   : > { %vm823_vm8 = vcmp.eq.s32.totalorder %v4670_v12, %v645_v29  ;;  %vm824_vm9 = vcmp.eq.s32.totalorder %v4670_v12, %v648_v28 }
  0xa8   : > { %v3442_v31 = vsel %vm823_vm8, 1.0, %v4462_v15  ;;  %v3443_v34 = vsel %vm824_vm9, 1.0, %v4462_v15 }
  0xa9   : > { %3935 = vmatmul.mubr.msk.f32.gmra.mrb[4].mxu0 %vm1077_vm1, %v3441_v30 }
  0xaa   : > { %v654_v32 = vpop.permute.xlu1 %653  ;;  %3937 = vmatprep.mubr.msk.f32.mxu0 %vm1077_vm1, %v3442_v31  ;;  %v651_v33 = vpop.permute.xlu0 %650 }
  0xab   : > { %vm825_vm10 = vcmp.eq.s32.totalorder %v4670_v12, %v651_v33  ;;  %vm826_vm11 = vcmp.eq.s32.totalorder %v4670_v12, %v654_v32 }
  0xac   : > { %v3444_v35 = vsel %vm825_vm10, 1.0, %v4462_v15  ;;  %v3445_v38 = vsel %vm826_vm11, 1.0, %v4462_v15 }
  0xad   : > { %3938 = vmatmul.mubr.msk.f32.gmra.mrb[6].mxu0 %vm1077_vm1, %v3443_v34 }
  0xae   : > { %v660_v36 = vpop.permute.xlu1 %659  ;;  %3940 = vmatprep.mubr.msk.f32.mxu0 %vm1077_vm1, %v3444_v35  ;;  %v657_v37 = vpop.permute.xlu0 %656 }
  0xaf   : > { %vm827_vm12 = vcmp.eq.s32.totalorder %v4670_v12, %v657_v37  ;;  %vm828_vm13 = vcmp.eq.s32.totalorder %v4670_v12, %v660_v36 }
  0xb0   : > { %v3446_v39 = vsel %vm827_vm12, 1.0, %v4462_v15  ;;  %v3447_v42 = vsel %vm828_vm13, 1.0, %v4462_v15 }
  0xb1   : > { %3941 = vmatmul.mubr.msk.f32.gmra.mrb[8].mxu0 %vm1077_vm1, %v3445_v38 }
  0xb2   : > { %v666_v40 = vpop.permute.xlu1 %665  ;;  %3943 = vmatprep.mubr.msk.f32.mxu0 %vm1077_vm1, %v3446_v39  ;;  %v663_v41 = vpop.permute.xlu0 %662 }
  0xb3   : > { %vm829_vm14 = vcmp.eq.s32.totalorder %v4670_v12, %v663_v41  ;;  %vm830_vm15 = vcmp.eq.s32.totalorder %v4670_v12, %v666_v40 }
  0xb4   : > { %v3448_v43 = vsel %vm829_vm14, 1.0, %v4462_v15  ;;  %v3449_v46 = vsel %vm830_vm15, 1.0, %v4462_v15 }
  0xb5   : > { %3944 = vmatmul.mubr.msk.f32.gmra.mrb[10].mxu0 %vm1077_vm1, %v3447_v42 }
  0xb6   : > { %v672_v44 = vpop.permute.xlu1 %671  ;;  %3946 = vmatprep.mubr.msk.f32.mxu0 %vm1077_vm1, %v3448_v43  ;;  %v669_v45 = vpop.permute.xlu0 %668 }
  0xb7   : > { %vm831_vm0 = vcmp.eq.s32.totalorder %v4670_v12, %v669_v45  ;;  %vm832_vm2 = vcmp.eq.s32.totalorder %v4670_v12, %v672_v44  ;;  %v1657_v45 = vld [vmem:[%s5733_s5 + $0x10] sm:$0xff] }
  0xb8   : > { %v3450_v47 = vsel %vm831_vm0, 1.0, %v4462_v15  ;;  %v3451_v50 = vsel %vm832_vm2, 1.0, %v4462_v15 }
  0xb9   : > { %3947 = vmatmul.mubr.msk.f32.gmra.mrb[12].mxu0 %vm1077_vm1, %v3449_v46  ;;  %v1658_v46 = vld [vmem:[%s5733_s5 + $0x18] sm:$0xff] }
  0xba   : > { %v678_v48 = vpop.permute.xlu1 %677  ;;  %3949 = vmatprep.mubr.msk.f32.mxu0 %vm1077_vm1, %v3450_v47  ;;  %v675_v49 = vpop.permute.xlu0 %674  ;;  %v4168_v47 = vpack.c.bf16 %v1658_v46, %v1657_v45 }
  0xbb   : > { %vm833_vm3 = vcmp.eq.s32.totalorder %v4670_v12, %v675_v49  ;;  %vm834_vm4 = vcmp.eq.s32.totalorder %v4670_v12, %v678_v48 }
  0xbc   : > { %v3452_v51 = vsel %vm833_vm3, 1.0, %v4462_v15  ;;  %v3453_v54 = vsel %vm834_vm4, 1.0, %v4462_v15  ;;  %4169 = vmatprep.subr.bf16.mxu1 %v4168_v47 }
  0xbd   : > { %3950 = vmatmul.mubr.msk.f32.gmra.mrb[14].mxu0 %vm1077_vm1, %v3451_v50  ;;  %4171 = vmatpush3.bf16.msra.mxu1 %v4168_v47 }
  0xbe   : > { %v684_v52 = vpop.permute.xlu1 %683  ;;  %3952 = vmatprep.mubr.msk.f32.mxu0 %vm1077_vm1, %v3452_v51  ;;  %v681_v53 = vpop.permute.xlu0 %680 }
  0xbf   : > { %vm835_vm5 = vcmp.eq.s32.totalorder %v4670_v12, %v681_v53  ;;  %vm836_vm6 = vcmp.eq.s32.totalorder %v4670_v12, %v684_v52 }
  0xc0   : > { %v3454_v55 = vsel %vm835_vm5, 1.0, %v4462_v15  ;;  %v3455_v58 = vsel %vm836_vm6, 1.0, %v4462_v15 }
  0xc1   : > { %3953 = vmatmul.mubr.msk.f32.gmra.mrb[16].mxu0 %vm1077_vm1, %v3453_v54 }
  0xc2   : > { %v690_v56 = vpop.permute.xlu1 %689  ;;  %3955 = vmatprep.mubr.msk.f32.mxu0 %vm1077_vm1, %v3454_v55  ;;  %v687_v57 = vpop.permute.xlu0 %686 }
  0xc3   : > { %vm837_vm7 = vcmp.eq.s32.totalorder %v4670_v12, %v687_v57  ;;  %vm838_vm8 = vcmp.eq.s32.totalorder %v4670_v12, %v690_v56 }
  0xc4   : > { %v3456_v59 = vsel %vm837_vm7, 1.0, %v4462_v15  ;;  %v3457_v62 = vsel %vm838_vm8, 1.0, %v4462_v15 }
  0xc5   : > { %3956 = vmatmul.mubr.msk.f32.gmra.mrb[18].mxu0 %vm1077_vm1, %v3455_v58 }
  0xc6   : > { %v696_v60 = vpop.permute.xlu1 %695  ;;  %3958 = vmatprep.mubr.msk.f32.mxu0 %vm1077_vm1, %v3456_v59  ;;  %v693_v61 = vpop.permute.xlu0 %692 }
  0xc7   : > { %vm839_vm9 = vcmp.eq.s32.totalorder %v4670_v12, %v693_v61  ;;  %vm840_vm10 = vcmp.eq.s32.totalorder %v4670_v12, %v696_v60 }
  0xc8   : > { %v3458_v63 = vsel %vm839_vm9, 1.0, %v4462_v15  ;;  %v3459_v2 = vsel %vm840_vm10, 1.0, %v4462_v15 }
  0xc9   : > { %3959 = vmatmul.mubr.msk.f32.gmra.mrb[20].mxu0 %vm1077_vm1, %v3457_v62 }
  0xca   : > { %v702_v0 = vpop.permute.xlu1 %701  ;;  %3961 = vmatprep.mubr.msk.f32.mxu0 %vm1077_vm1, %v3458_v63  ;;  %v699_v1 = vpop.permute.xlu0 %698 }
  0xcb   : > { %vm841_vm11 = vcmp.eq.s32.totalorder %v4670_v12, %v699_v1  ;;  %vm842_vm12 = vcmp.eq.s32.totalorder %v4670_v12, %v702_v0 }
  0xcc   : > { %v3460_v3 = vsel %vm841_vm11, 1.0, %v4462_v15  ;;  %v3461_v6 = vsel %vm842_vm12, 1.0, %v4462_v15 }
  0xcd   : > { %3962 = vmatmul.mubr.msk.f32.gmra.mrb[22].mxu0 %vm1077_vm1, %v3459_v2 }
  0xce   : > { %v708_v4 = vpop.permute.xlu1 %707  ;;  %3964 = vmatprep.mubr.msk.f32.mxu0 %vm1077_vm1, %v3460_v3  ;;  %v705_v5 = vpop.permute.xlu0 %704 }
  0xcf   : > { %vm843_vm13 = vcmp.eq.s32.totalorder %v4670_v12, %v705_v5  ;;  %vm844_vm14 = vcmp.eq.s32.totalorder %v4670_v12, %v708_v4 }
  0xd0   : > { %v3462_v7 = vsel %vm843_vm13, 1.0, %v4462_v15  ;;  %v3463_v11 = vsel %vm844_vm14, 1.0, %v4462_v15 }
  0xd1   : > { %3965 = vmatmul.mubr.msk.f32.gmra.mrb[24].mxu0 %vm1077_vm1, %v3461_v6 }
  0xd2   : > { %v714_v8 = vpop.permute.xlu1 %713  ;;  %3967 = vmatprep.mubr.msk.f32.mxu0 %vm1077_vm1, %v3462_v7  ;;  %v711_v10 = vpop.permute.xlu0 %710 }
  0xd3   : > { %vm845_vm15 = vcmp.eq.s32.totalorder %v4670_v12, %v711_v10  ;;  %vm846_vm0 = vcmp.eq.s32.totalorder %v4670_v12, %v714_v8 }
  0xd4   : > { %v3464_v13 = vsel %vm845_vm15, 1.0, %v4462_v15  ;;  %v3465_v17 = vsel %vm846_vm0, 1.0, %v4462_v15 }
  0xd5   : > { %3968 = vmatmul.mubr.msk.f32.gmra.mrb[26].mxu0 %vm1077_vm1, %v3463_v11 }
  0xd6   : > { %v720_v14 = vpop.permute.xlu1 %719  ;;  %3970 = vmatprep.mubr.msk.f32.mxu0 %vm1077_vm1, %v3464_v13  ;;  %v717_v16 = vpop.permute.xlu0 %716 }
  0xd7   : > { %vm847_vm2 = vcmp.eq.s32.totalorder %v4670_v12, %v717_v16  ;;  %vm848_vm3 = vcmp.eq.s32.totalorder %v4670_v12, %v720_v14 }
  0xd8   : > { %v3466_v18 = vsel %vm847_vm2, 1.0, %v4462_v15  ;;  %v3467_v21 = vsel %vm848_vm3, 1.0, %v4462_v15 }
  0xd9   : > { %3971 = vmatmul.mubr.msk.f32.gmra.mrb[28].mxu0 %vm1077_vm1, %v3465_v17 }
  0xda   : > { %v726_v19 = vpop.permute.xlu1 %725  ;;  %3973 = vmatprep.mubr.msk.f32.mxu0 %vm1077_vm1, %v3466_v18  ;;  %v723_v20 = vpop.permute.xlu0 %722 }
  0xdb   : > { %vm849_vm4 = vcmp.eq.s32.totalorder %v4670_v12, %v723_v20  ;;  %vm850_vm5 = vcmp.eq.s32.totalorder %v4670_v12, %v726_v19 }
  0xdc   : > { %v3468_v22 = vsel %vm849_vm4, 1.0, %v4462_v15  ;;  %v3469_v25 = vsel %vm850_vm5, 1.0, %v4462_v15 }
  0xdd   : > { %3974 = vmatmul.mubr.msk.f32.gmra.mrb[30].mxu0 %vm1077_vm1, %v3467_v21 }
  0xde   : > { %v732_v23 = vpop.permute.xlu1 %731  ;;  %3976 = vmatprep.mubr.msk.f32.mxu0 %vm1077_vm1, %v3468_v22  ;;  %v729_v24 = vpop.permute.xlu0 %728 }
  0xdf   : > { %vm851_vm6 = vcmp.eq.s32.totalorder %v4670_v12, %v729_v24  ;;  %vm852_vm7 = vcmp.eq.s32.totalorder %v4670_v12, %v732_v23 }
  0xe0   : > { %v3470_v26 = vsel %vm851_vm6, 1.0, %v4462_v15  ;;  %v3471_v29 = vsel %vm852_vm7, 1.0, %v4462_v15 }
  0xe1   : > { %3977 = vmatmul.mubr.msk.f32.gmra.mrb[32].mxu0 %vm1077_vm1, %v3469_v25 }
  0xe2   : > { %v738_v27 = vpop.permute.xlu1 %737  ;;  %3979 = vmatprep.mubr.msk.f32.mxu0 %vm1077_vm1, %v3470_v26  ;;  %v735_v28 = vpop.permute.xlu0 %734  ;;  %v1013_v26 = vld [vmem:[%s4573_s16] sm:$0xff] }
  0xe3   : > { %vm853_vm8 = vcmp.eq.s32.totalorder %v4670_v12, %v735_v28  ;;  %vm854_vm9 = vcmp.eq.s32.totalorder %v4670_v12, %v738_v27  ;;  %v1014_v27 = vld [vmem:[%s4573_s16 + $0x8] sm:$0xff] }
  0xe4   : > { %v3472_v30 = vsel %vm853_vm8, 1.0, %v4462_v15  ;;  %v3473_v33 = vsel %vm854_vm9, 1.0, %v4462_v15 }
  0xe5   : > { %3980 = vmatmul.mubr.msk.f32.gmra.mrb[34].mxu0 %vm1077_vm1, %v3471_v29 }
  0xe6   : > { %v744_v31 = vpop.permute.xlu1 %743  ;;  %3982 = vmatprep.mubr.msk.f32.mxu0 %vm1077_vm1, %v3472_v30  ;;  %v741_v32 = vpop.permute.xlu0 %740 }
  0xe7   : > { %vm855_vm10 = vcmp.eq.s32.totalorder %v4670_v12, %v741_v32  ;;  %vm856_vm11 = vcmp.eq.s32.totalorder %v4670_v12, %v744_v31  ;;  %v1015_v32 = vld [vmem:[%s4573_s16 + $0x10] sm:$0xff] }
  0xe8   : > { %v3474_v34 = vsel %vm855_vm10, 1.0, %v4462_v15  ;;  %v3475_v37 = vsel %vm856_vm11, 1.0, %v4462_v15 }
  0xe9   : > { %3983 = vmatmul.mubr.msk.f32.gmra.mrb[36].mxu0 %vm1077_vm1, %v3473_v33  ;;  %v1016_v33 = vld [vmem:[%s4573_s16 + $0x18] sm:$0xff] }
  0xea   : > { %v750_v35 = vpop.permute.xlu1 %749  ;;  %3985 = vmatprep.mubr.msk.f32.mxu0 %vm1077_vm1, %v3474_v34  ;;  %v747_v36 = vpop.permute.xlu0 %746 }
  0xeb   : > { %vm857_vm12 = vcmp.eq.s32.totalorder %v4670_v12, %v747_v36  ;;  %vm858_vm13 = vcmp.eq.s32.totalorder %v4670_v12, %v750_v35  ;;  %v1017_v36 = vld [vmem:[%s4573_s16 + $0x20] sm:$0xff] }
  0xec   : > { %v3476_v38 = vsel %vm857_vm12, 1.0, %v4462_v15  ;;  %v3477_v41 = vsel %vm858_vm13, 1.0, %v4462_v15 }
  0xed   : > { %3986 = vmatmul.mubr.msk.f32.gmra.mrb[38].mxu0 %vm1077_vm1, %v3475_v37  ;;  %v1018_v37 = vld [vmem:[%s4573_s16 + $0x28] sm:$0xff] }
  0xee   : > { %v756_v39 = vpop.permute.xlu1 %755  ;;  %3988 = vmatprep.mubr.msk.f32.mxu0 %vm1077_vm1, %v3476_v38  ;;  %v753_v40 = vpop.permute.xlu0 %752 }
  0xef   : > { %vm859_vm14 = vcmp.eq.s32.totalorder %v4670_v12, %v753_v40  ;;  %vm860_vm15 = vcmp.eq.s32.totalorder %v4670_v12, %v756_v39 }
  0xf0   : > { %v3478_v42 = vsel %vm859_vm14, 1.0, %v4462_v15  ;;  %v3479_v48 = vsel %vm860_vm15, 1.0, %v4462_v15 }
  0xf1   : > { %3989 = vmatmul.mubr.msk.f32.gmra.mrb[40].mxu0 %vm1077_vm1, %v3477_v41 }
  0xf2   : > { %v762_v43 = vpop.permute.xlu1 %761  ;;  %3991 = vmatprep.mubr.msk.f32.mxu0 %vm1077_vm1, %v3478_v42  ;;  %v759_v44 = vpop.permute.xlu0 %758  ;;  %v1019_v42 = vld [vmem:[%s4573_s16 + $0x30] sm:$0xff] }
  0xf3   : > { %vm861_vm0 = vcmp.eq.s32.totalorder %v4670_v12, %v759_v44  ;;  %vm862_vm2 = vcmp.eq.s32.totalorder %v4670_v12, %v762_v43  ;;  %v1020_v43 = vld [vmem:[%s4573_s16 + $0x38] sm:$0xff] }
  0xf4   : > { %v3480_v49 = vsel %vm861_vm0, 1.0, %v4462_v15  ;;  %v3481_v52 = vsel %vm862_vm2, 1.0, %v4462_v15 }
  0xf5   : > { %3992 = vmatmul.mubr.msk.f32.gmra.mrb[42].mxu0 %vm1077_vm1, %v3479_v48  ;;  %v1021_v48 = vld [vmem:[%s4573_s16 + $0x40] sm:$0xff] }
  0xf6   : > { %v768_v50 = vpop.permute.xlu1 %767  ;;  %3994 = vmatprep.mubr.msk.f32.mxu0 %vm1077_vm1, %v3480_v49  ;;  %v765_v51 = vpop.permute.xlu0 %764  ;;  %v1022_v49 = vld [vmem:[%s4573_s16 + $0x48] sm:$0xff] }
  0xf7   : > { %vm863_vm3 = vcmp.eq.s32.totalorder %v4670_v12, %v765_v51  ;;  %vm864_vm4 = vcmp.eq.s32.totalorder %v4670_v12, %v768_v50 }
  0xf8   : > { %v3482_v53 = vsel %vm863_vm3, 1.0, %v4462_v15  ;;  %v3483_v56 = vsel %vm864_vm4, 1.0, %v4462_v15 }
  0xf9   : > { %3995 = vmatmul.mubr.msk.f32.gmra.mrb[44].mxu0 %vm1077_vm1, %v3481_v52 }
  0xfa   : > { %v774_v54 = vpop.permute.xlu1 %773  ;;  %3997 = vmatprep.mubr.msk.f32.mxu0 %vm1077_vm1, %v3482_v53  ;;  %v771_v55 = vpop.permute.xlu0 %770 }
  0xfb   : > { %vm865_vm5 = vcmp.eq.s32.totalorder %v4670_v12, %v771_v55  ;;  %vm866_vm6 = vcmp.eq.s32.totalorder %v4670_v12, %v774_v54  ;;  %v1023_v54 = vld [vmem:[%s4573_s16 + $0x50] sm:$0xff]  ;;  %v1024_v55 = vld [vmem:[%s4573_s16 + $0x58] sm:$0xff] }
  0xfc   : > { %v3484_v57 = vsel %vm865_vm5, 1.0, %v4462_v15  ;;  %v3485_v60 = vsel %vm866_vm6, 1.0, %v4462_v15 }
  0xfd   : > { %3998 = vmatmul.mubr.msk.f32.gmra.mrb[46].mxu0 %vm1077_vm1, %v3483_v56 }
  0xfe   : > { %v780_v58 = vpop.permute.xlu1 %779  ;;  %4000 = vmatprep.mubr.msk.f32.mxu0 %vm1077_vm1, %v3484_v57  ;;  %v777_v59 = vpop.permute.xlu0 %776 }
  0xff   : > { %vm867_vm7 = vcmp.eq.s32.totalorder %v4670_v12, %v777_v59  ;;  %vm868_vm8 = vcmp.eq.s32.totalorder %v4670_v12, %v780_v58 }
 0x100   : > { %v3486_v61 = vsel %vm867_vm7, 1.0, %v4462_v15  ;;  %v3487_v0 = vsel %vm868_vm8, 1.0, %v4462_v15 }
 0x101   : > { %4001 = vmatmul.mubr.msk.f32.gmra.mrb[48].mxu0 %vm1077_vm1, %v3485_v60  ;;  %v1025_v60 = vld [vmem:[%s4573_s16 + $0x60] sm:$0xff] }
 0x102   : > { %v786_v62 = vpop.permute.xlu1 %785  ;;  %4003 = vmatprep.mubr.msk.f32.mxu0 %vm1077_vm1, %v3486_v61  ;;  %v783_v63 = vpop.permute.xlu0 %782  ;;  %v1026_v61 = vld [vmem:[%s4573_s16 + $0x68] sm:$0xff] }
 0x103   : > { %vm869_vm9 = vcmp.eq.s32.totalorder %v4670_v12, %v783_v63  ;;  %vm870_vm10 = vcmp.eq.s32.totalorder %v4670_v12, %v786_v62 }
 0x104   : > { %v3488_v1 = vsel %vm869_vm9, 1.0, %v4462_v15  ;;  %v3489_v4 = vsel %vm870_vm10, 1.0, %v4462_v15 }
 0x105   : > { %4004 = vmatmul.mubr.msk.f32.gmra.mrb[50].mxu0 %vm1077_vm1, %v3487_v0 }
 0x106   : > { %v792_v2 = vpop.permute.xlu1 %791  ;;  %4006 = vmatprep.mubr.msk.f32.mxu0 %vm1077_vm1, %v3488_v1  ;;  %v789_v3 = vpop.permute.xlu0 %788 }
 0x107   : > { %vm871_vm11 = vcmp.eq.s32.totalorder %v4670_v12, %v789_v3  ;;  %vm872_vm12 = vcmp.eq.s32.totalorder %v4670_v12, %v792_v2  ;;  %v1027_v2 = vld [vmem:[%s4573_s16 + $0x70] sm:$0xff]  ;;  %v1028_v3 = vld [vmem:[%s4573_s16 + $0x78] sm:$0xff] }
 0x108   : > { %v3490_v5 = vsel %vm871_vm11, 1.0, %v4462_v15  ;;  %v3491_v8 = vsel %vm872_vm12, 1.0, %v4462_v15 }
 0x109   : > { %4007 = vmatmul.mubr.msk.f32.gmra.mrb[52].mxu0 %vm1077_vm1, %v3489_v4 }
 0x10a   : > { %v798_v6 = vpop.permute.xlu1 %797  ;;  %4009 = vmatprep.mubr.msk.f32.mxu0 %vm1077_vm1, %v3490_v5  ;;  %v795_v7 = vpop.permute.xlu0 %794 }
 0x10b   : > { %vm873_vm13 = vcmp.eq.s32.totalorder %v4670_v12, %v795_v7  ;;  %vm874_vm14 = vcmp.eq.s32.totalorder %v4670_v12, %v798_v6 }
 0x10c   : > { %v3492_v10 = vsel %vm873_vm13, 1.0, %v4462_v15  ;;  %v3493_v14 = vsel %vm874_vm14, 1.0, %v4462_v15 }
 0x10d   : > { %4010 = vmatmul.mubr.msk.f32.gmra.mrb[54].mxu0 %vm1077_vm1, %v3491_v8  ;;  %v1029_v8 = vld [vmem:[%s4573_s16 + $0x80] sm:$0xff] }
 0x10e   : > { %v804_v11 = vpop.permute.xlu1 %803  ;;  %4012 = vmatprep.mubr.msk.f32.mxu0 %vm1077_vm1, %v3492_v10  ;;  %v801_v13 = vpop.permute.xlu0 %800  ;;  %v1030_v10 = vld [vmem:[%s4573_s16 + $0x88] sm:$0xff] }
 0x10f   : > { %vm875_vm15 = vcmp.eq.s32.totalorder %v4670_v12, %v801_v13  ;;  %vm876_vm0 = vcmp.eq.s32.totalorder %v4670_v12, %v804_v11 }
 0x110   : > { %v3494_v16 = vsel %vm875_vm15, 1.0, %v4462_v15  ;;  %v3495_v19 = vsel %vm876_vm0, 1.0, %v4462_v15 }
 0x111   : > { %4013 = vmatmul.mubr.msk.f32.gmra.mrb[56].mxu0 %vm1077_vm1, %v3493_v14 }
 0x112   : > { %v810_v17 = vpop.permute.xlu1 %809  ;;  %4015 = vmatprep.mubr.msk.f32.mxu0 %vm1077_vm1, %v3494_v16  ;;  %v807_v18 = vpop.permute.xlu0 %806 }
 0x113   : > { %vm877_vm2 = vcmp.eq.s32.totalorder %v4670_v12, %v807_v18  ;;  %vm878_vm3 = vcmp.eq.s32.totalorder %v4670_v12, %v810_v17  ;;  %v1031_v17 = vld [vmem:[%s4573_s16 + $0x90] sm:$0xff]  ;;  %v1032_v18 = vld [vmem:[%s4573_s16 + $0x98] sm:$0xff] }
 0x114   : > { %v3496_v20 = vsel %vm877_vm2, 1.0, %v4462_v15  ;;  %v3497_v23 = vsel %vm878_vm3, 1.0, %v4462_v15 }
 0x115   : > { %4016 = vmatmul.mubr.msk.f32.gmra.mrb[58].mxu0 %vm1077_vm1, %v3495_v19 }
 0x116   : > { %v816_v21 = vpop.permute.xlu1 %815  ;;  %4018 = vmatprep.mubr.msk.f32.mxu0 %vm1077_vm1, %v3496_v20  ;;  %v813_v22 = vpop.permute.xlu0 %812 }
 0x117   : > { %vm879_vm4 = vcmp.eq.s32.totalorder %v4670_v12, %v813_v22  ;;  %vm880_vm5 = vcmp.eq.s32.totalorder %v4670_v12, %v816_v21 }
 0x118   : > { %v3498_v24 = vsel %vm879_vm4, 1.0, %v4462_v15  ;;  %v3499_v25 = vsel %vm880_vm5, 1.0, %v4462_v15 }
 0x119   : > { %4019 = vmatmul.mubr.msk.f32.gmra.mrb[60].mxu0 %vm1077_vm1, %v3497_v23  ;;  %v1033_v23 = vld [vmem:[%s4573_s16 + $0xa0] sm:$0xff] }
 0x11a   : > { %4021 = vmatprep.mubr.msk.f32.mxu0 %vm1077_vm1, %v3498_v24  ;;  %v1034_v24 = vld [vmem:[%s4573_s16 + $0xa8] sm:$0xff] }
 0x11d   : > { %4022 = vmatmul.mubr.msk.f32.gmra.mrb[62].mxu0 %vm1077_vm1, %v3499_v25 }
 0x174   : > { %v3930_v28 = vpop.f32.mrb[0].mxu0 }
 0x175   : > { %v1336_v29 = vpop.f32.mrb[1].mxu0  ;;  %v1342_v31 = vadd.f32 %v3930_v28, %v1014_v27 }
 0x176   : > { %v1337_v30 = vadd.f32 %v1336_v29, %v1013_v26  ;;  %v1035_v29 = vld [vmem:[%s4573_s16 + $0xb0] sm:$0xff] }
 0x178   : > { %v3933_v12 = vpop.f32.mrb[2].mxu0  ;;  %4032 = vmatprep.mubr.msk.f32.mxu1 %vm1077_vm1, %v1337_v30  ;;  %v1036_v30 = vld [vmem:[%s4573_s16 + $0xb8] sm:$0xff] }
 0x179   : > { %v1346_v34 = vpop.f32.mrb[3].mxu0  ;;  %4033 = vmatmul.mubr.msk.f32.vlgmr.msra.gmra.mrb[0].mxu1 %vm1077_vm1, %v1342_v31  ;;  %v1352_v35 = vadd.f32 %v3933_v12, %v1016_v33 }
 0x17a   : > { %v1347_v15 = vadd.f32 %v1346_v34, %v1015_v32  ;;  %v1037_v34 = vld [vmem:[%s4573_s16 + $0xc0] sm:$0xff] }
 0x17c   : > { %v3936_v38 = vpop.f32.mrb[4].mxu0  ;;  %4035 = vmatprep.mubr.msk.f32.mxu1 %vm1077_vm1, %v1347_v15  ;;  %v1038_v15 = vld [vmem:[%s4573_s16 + $0xc8] sm:$0xff] }
 0x17d   : > { %v1356_v39 = vpop.f32.mrb[5].mxu0  ;;  %4036 = vmatmul.mubr.msk.f32.gmra.mrb[2].mxu1 %vm1077_vm1, %v1352_v35  ;;  %v1362_v41 = vadd.f32 %v3936_v38, %v1018_v37 }
 0x17e   : > { %v1357_v40 = vadd.f32 %v1356_v39, %v1017_v36  ;;  %v1039_v39 = vld [vmem:[%s4573_s16 + $0xd0] sm:$0xff] }
 0x180   : > { %v3939_v44 = vpop.f32.mrb[6].mxu0  ;;  %4038 = vmatprep.mubr.msk.f32.mxu1 %vm1077_vm1, %v1357_v40  ;;  %v1040_v40 = vld [vmem:[%s4573_s16 + $0xd8] sm:$0xff] }
 0x181   : > { %v1366_v45 = vpop.f32.mrb[7].mxu0  ;;  %4039 = vmatmul.mubr.msk.f32.gmra.mrb[4].mxu1 %vm1077_vm1, %v1362_v41  ;;  %v1372_v47 = vadd.f32 %v3939_v44, %v1020_v43 }
 0x182   : > { %v1367_v46 = vadd.f32 %v1366_v45, %v1019_v42  ;;  %v1041_v45 = vld [vmem:[%s4573_s16 + $0xe0] sm:$0xff] }
 0x184   : > { %v3942_v50 = vpop.f32.mrb[8].mxu0  ;;  %4041 = vmatprep.mubr.msk.f32.mxu1 %vm1077_vm1, %v1367_v46  ;;  %v1042_v46 = vld [vmem:[%s4573_s16 + $0xe8] sm:$0xff] }
 0x185   : > { %v1376_v51 = vpop.f32.mrb[9].mxu0  ;;  %4042 = vmatmul.mubr.msk.f32.gmra.mrb[6].mxu1 %vm1077_vm1, %v1372_v47  ;;  %v1382_v53 = vadd.f32 %v3942_v50, %v1022_v49 }
 0x186   : > { %v1377_v52 = vadd.f32 %v1376_v51, %v1021_v48  ;;  %v1043_v51 = vld [vmem:[%s4573_s16 + $0xf0] sm:$0xff] }
 0x188   : > { %v3945_v56 = vpop.f32.mrb[10].mxu0  ;;  %4044 = vmatprep.mubr.msk.f32.mxu1 %vm1077_vm1, %v1377_v52  ;;  %v1044_v52 = vld [vmem:[%s4573_s16 + $0xf8] sm:$0xff] }
 0x189   : > { %v1386_v57 = vpop.f32.mrb[11].mxu0  ;;  %4045 = vmatmul.mubr.msk.f32.gmra.mrb[8].mxu1 %vm1077_vm1, %v1382_v53  ;;  %v1392_v59 = vadd.f32 %v3945_v56, %v1024_v55 }
 0x18a   : > { %v1387_v58 = vadd.f32 %v1386_v57, %v1023_v54  ;;  %v1045_v57 = vld [vmem:[%s4573_s16 + $0x100] sm:$0xff] }
 0x18c   : > { %v3948_v62 = vpop.f32.mrb[12].mxu0  ;;  %4047 = vmatprep.mubr.msk.f32.mxu1 %vm1077_vm1, %v1387_v58  ;;  %v1046_v58 = vld [vmem:[%s4573_s16 + $0x108] sm:$0xff] }
 0x18d   : > { %v1396_v63 = vpop.f32.mrb[13].mxu0  ;;  %4048 = vmatmul.mubr.msk.f32.gmra.mrb[10].mxu1 %vm1077_vm1, %v1392_v59  ;;  %v1402_v1 = vadd.f32 %v3948_v62, %v1026_v61 }
 0x18e   : > { %v1397_v0 = vadd.f32 %v1396_v63, %v1025_v60  ;;  %v1047_v63 = vld [vmem:[%s4573_s16 + $0x110] sm:$0xff] }
 0x190   : > { %v3951_v4 = vpop.f32.mrb[14].mxu0  ;;  %4050 = vmatprep.mubr.msk.f32.mxu1 %vm1077_vm1, %v1397_v0  ;;  %v1048_v0 = vld [vmem:[%s4573_s16 + $0x118] sm:$0xff] }
 0x191   : > { %v1406_v5 = vpop.f32.mrb[15].mxu0  ;;  %4051 = vmatmul.mubr.msk.f32.gmra.mrb[12].mxu1 %vm1077_vm1, %v1402_v1  ;;  %v1412_v7 = vadd.f32 %v3951_v4, %v1028_v3 }
 0x192   : > { %v1407_v6 = vadd.f32 %v1406_v5, %v1027_v2  ;;  %v1049_v5 = vld [vmem:[%s4573_s16 + $0x120] sm:$0xff] }
 0x194   : > { %v3954_v11 = vpop.f32.mrb[16].mxu0  ;;  %4053 = vmatprep.mubr.msk.f32.mxu1 %vm1077_vm1, %v1407_v6  ;;  %v1050_v6 = vld [vmem:[%s4573_s16 + $0x128] sm:$0xff] }
 0x195   : > { %v1416_v13 = vpop.f32.mrb[17].mxu0  ;;  %4054 = vmatmul.mubr.msk.f32.gmra.mrb[14].mxu1 %vm1077_vm1, %v1412_v7  ;;  %v1422_v16 = vadd.f32 %v3954_v11, %v1030_v10 }
 0x196   : > { %v1417_v14 = vadd.f32 %v1416_v13, %v1029_v8  ;;  %v1051_v13 = vld [vmem:[%s4573_s16 + $0x130] sm:$0xff] }
 0x198   : > { %v3957_v19 = vpop.f32.mrb[18].mxu0  ;;  %4056 = vmatprep.mubr.msk.f32.mxu1 %vm1077_vm1, %v1417_v14  ;;  %v1052_v14 = vld [vmem:[%s4573_s16 + $0x138] sm:$0xff] }
 0x199   : > { %v1426_v20 = vpop.f32.mrb[19].mxu0  ;;  %4057 = vmatmul.mubr.msk.f32.gmra.mrb[16].mxu1 %vm1077_vm1, %v1422_v16  ;;  %v1432_v22 = vadd.f32 %v3957_v19, %v1032_v18 }
 0x19a   : > { %v1427_v21 = vadd.f32 %v1426_v20, %v1031_v17  ;;  %v1053_v20 = vld [vmem:[%s4573_s16 + $0x140] sm:$0xff] }
 0x19c   : > { %v3960_v25 = vpop.f32.mrb[20].mxu0  ;;  %4059 = vmatprep.mubr.msk.f32.mxu1 %vm1077_vm1, %v1427_v21  ;;  %v1054_v21 = vld [vmem:[%s4573_s16 + $0x148] sm:$0xff] }
 0x19d   : > { %v1436_v26 = vpop.f32.mrb[21].mxu0  ;;  %4060 = vmatmul.mubr.msk.f32.gmra.mrb[18].mxu1 %vm1077_vm1, %v1432_v22  ;;  %v1442_v28 = vadd.f32 %v3960_v25, %v1034_v24 }
 0x19e   : > { %v1437_v27 = vadd.f32 %v1436_v26, %v1033_v23  ;;  %v1055_v26 = vld [vmem:[%s4573_s16 + $0x150] sm:$0xff] }
 0x1a0   : > { %v3963_v31 = vpop.f32.mrb[22].mxu0  ;;  %4062 = vmatprep.mubr.msk.f32.mxu1 %vm1077_vm1, %v1437_v27  ;;  %v1056_v27 = vld [vmem:[%s4573_s16 + $0x158] sm:$0xff] }
 0x1a1   : > { %v1446_v32 = vpop.f32.mrb[23].mxu0  ;;  %4063 = vmatmul.mubr.msk.f32.gmra.mrb[20].mxu1 %vm1077_vm1, %v1442_v28  ;;  %v1452_v12 = vadd.f32 %v3963_v31, %v1036_v30 }
 0x1a2   : > { %v1447_v33 = vadd.f32 %v1446_v32, %v1035_v29  ;;  %v1057_v32 = vld [vmem:[%s4573_s16 + $0x160] sm:$0xff] }
 0x1a4   : > { %v3966_v35 = vpop.f32.mrb[24].mxu0  ;;  %4065 = vmatprep.mubr.msk.f32.mxu1 %vm1077_vm1, %v1447_v33  ;;  %v1058_v33 = vld [vmem:[%s4573_s16 + $0x168] sm:$0xff] }
 0x1a5   : > { %v1456_v36 = vpop.f32.mrb[25].mxu0  ;;  %4066 = vmatmul.mubr.msk.f32.gmra.mrb[22].mxu1 %vm1077_vm1, %v1452_v12  ;;  %v1462_v38 = vadd.f32 %v3966_v35, %v1038_v15 }
 0x1a6   : > { %v1457_v37 = vadd.f32 %v1456_v36, %v1037_v34  ;;  %v1059_v36 = vld [vmem:[%s4573_s16 + $0x170] sm:$0xff] }
 0x1a8   : > { %v3969_v41 = vpop.f32.mrb[26].mxu0  ;;  %4068 = vmatprep.mubr.msk.f32.mxu1 %vm1077_vm1, %v1457_v37  ;;  %v1060_v37 = vld [vmem:[%s4573_s16 + $0x178] sm:$0xff] }
 0x1a9   : > { %v1466_v42 = vpop.f32.mrb[27].mxu0  ;;  %4069 = vmatmul.mubr.msk.f32.gmra.mrb[24].mxu1 %vm1077_vm1, %v1462_v38  ;;  %v1472_v44 = vadd.f32 %v3969_v41, %v1040_v40 }
 0x1aa   : > { %v1467_v43 = vadd.f32 %v1466_v42, %v1039_v39  ;;  %v1061_v42 = vld [vmem:[%s4573_s16 + $0x180] sm:$0xff] }
 0x1ac   : > { %v3972_v47 = vpop.f32.mrb[28].mxu0  ;;  %4071 = vmatprep.mubr.msk.f32.mxu1 %vm1077_vm1, %v1467_v43  ;;  %v1062_v43 = vld [vmem:[%s4573_s16 + $0x188] sm:$0xff] }
 0x1ad   : > { %v1476_v48 = vpop.f32.mrb[29].mxu0  ;;  %4072 = vmatmul.mubr.msk.f32.gmra.mrb[26].mxu1 %vm1077_vm1, %v1472_v44  ;;  %v1482_v50 = vadd.f32 %v3972_v47, %v1042_v46 }
 0x1ae   : > { %v1477_v49 = vadd.f32 %v1476_v48, %v1041_v45  ;;  %v1063_v48 = vld [vmem:[%s4573_s16 + $0x190] sm:$0xff] }
 0x1b0   : > { %v3975_v53 = vpop.f32.mrb[30].mxu0  ;;  %4074 = vmatprep.mubr.msk.f32.mxu1 %vm1077_vm1, %v1477_v49  ;;  %v1064_v49 = vld [vmem:[%s4573_s16 + $0x198] sm:$0xff] }
 0x1b1   : > { %v1486_v54 = vpop.f32.mrb[31].mxu0  ;;  %4075 = vmatmul.mubr.msk.f32.gmra.mrb[28].mxu1 %vm1077_vm1, %v1482_v50  ;;  %v1492_v56 = vadd.f32 %v3975_v53, %v1044_v52 }
 0x1b2   : > { %v1487_v55 = vadd.f32 %v1486_v54, %v1043_v51  ;;  %v1065_v54 = vld [vmem:[%s4573_s16 + $0x1a0] sm:$0xff] }
 0x1b4   : > { %v3978_v59 = vpop.f32.mrb[32].mxu0  ;;  %4077 = vmatprep.mubr.msk.f32.mxu1 %vm1077_vm1, %v1487_v55  ;;  %v1066_v55 = vld [vmem:[%s4573_s16 + $0x1a8] sm:$0xff] }
 0x1b5   : > { %v1496_v60 = vpop.f32.mrb[33].mxu0  ;;  %4078 = vmatmul.mubr.msk.f32.gmra.mrb[30].mxu1 %vm1077_vm1, %v1492_v56  ;;  %v1502_v62 = vadd.f32 %v3978_v59, %v1046_v58 }
 0x1b6   : > { %v1497_v61 = vadd.f32 %v1496_v60, %v1045_v57  ;;  %v1067_v60 = vld [vmem:[%s4573_s16 + $0x1b0] sm:$0xff] }
 0x1b8   : > { %v3981_v1 = vpop.f32.mrb[34].mxu0  ;;  %4080 = vmatprep.mubr.msk.f32.mxu1 %vm1077_vm1, %v1497_v61  ;;  %v1068_v61 = vld [vmem:[%s4573_s16 + $0x1b8] sm:$0xff] }
 0x1b9   : > { %v1506_v2 = vpop.f32.mrb[35].mxu0  ;;  %4081 = vmatmul.mubr.msk.f32.gmra.mrb[32].mxu1 %vm1077_vm1, %v1502_v62  ;;  %v1512_v4 = vadd.f32 %v3981_v1, %v1048_v0 }
 0x1ba   : > { %v1507_v3 = vadd.f32 %v1506_v2, %v1047_v63  ;;  %v1069_v2 = vld [vmem:[%s4573_s16 + $0x1c0] sm:$0xff] }
 0x1bc   : > { %v3984_v7 = vpop.f32.mrb[36].mxu0  ;;  %4083 = vmatprep.mubr.msk.f32.mxu1 %vm1077_vm1, %v1507_v3  ;;  %v1070_v3 = vld [vmem:[%s4573_s16 + $0x1c8] sm:$0xff] }
 0x1bd   : > { %v1516_v8 = vpop.f32.mrb[37].mxu0  ;;  %4084 = vmatmul.mubr.msk.f32.gmra.mrb[34].mxu1 %vm1077_vm1, %v1512_v4  ;;  %v1522_v11 = vadd.f32 %v3984_v7, %v1050_v6 }
 0x1be   : > { %v1517_v10 = vadd.f32 %v1516_v8, %v1049_v5  ;;  %v1071_v8 = vld [vmem:[%s4573_s16 + $0x1d0] sm:$0xff] }
 0x1c0   : > { %v3987_v16 = vpop.f32.mrb[38].mxu0  ;;  %4086 = vmatprep.mubr.msk.f32.mxu1 %vm1077_vm1, %v1517_v10  ;;  %v1072_v10 = vld [vmem:[%s4573_s16 + $0x1d8] sm:$0xff] }
 0x1c1   : > { %v1526_v17 = vpop.f32.mrb[39].mxu0  ;;  %4087 = vmatmul.mubr.msk.f32.gmra.mrb[36].mxu1 %vm1077_vm1, %v1522_v11  ;;  %v1532_v19 = vadd.f32 %v3987_v16, %v1052_v14 }
 0x1c2   : > { %v1527_v18 = vadd.f32 %v1526_v17, %v1051_v13  ;;  %v1073_v17 = vld [vmem:[%s4573_s16 + $0x1e0] sm:$0xff] }
 0x1c4   : > { %v3990_v22 = vpop.f32.mrb[40].mxu0  ;;  %4089 = vmatprep.mubr.msk.f32.mxu1 %vm1077_vm1, %v1527_v18  ;;  %v1074_v18 = vld [vmem:[%s4573_s16 + $0x1e8] sm:$0xff] }
 0x1c5   : > { %v1536_v23 = vpop.f32.mrb[41].mxu0  ;;  %4090 = vmatmul.mubr.msk.f32.gmra.mrb[38].mxu1 %vm1077_vm1, %v1532_v19  ;;  %v1542_v25 = vadd.f32 %v3990_v22, %v1054_v21 }
 0x1c6   : > { %v1537_v24 = vadd.f32 %v1536_v23, %v1053_v20  ;;  %v1075_v23 = vld [vmem:[%s4573_s16 + $0x1f0] sm:$0xff] }
 0x1c8   : > { %v3993_v28 = vpop.f32.mrb[42].mxu0  ;;  %4092 = vmatprep.mubr.msk.f32.mxu1 %vm1077_vm1, %v1537_v24  ;;  %v1076_v24 = vld [vmem:[%s4573_s16 + $0x1f8] sm:$0xff] }
 0x1c9   : > { %v1546_v29 = vpop.f32.mrb[43].mxu0  ;;  %4093 = vmatmul.mubr.msk.f32.gmra.mrb[40].mxu1 %vm1077_vm1, %v1542_v25  ;;  %v1552_v31 = vadd.f32 %v3993_v28, %v1056_v27 }
 0x1ca   : > { %v1547_v30 = vadd.f32 %v1546_v29, %v1055_v26  ;;  %v5007_v29 = vld [vmem:[%s5734_s6] ss:$0 sm:$0xff] }
 0x1cc   : > { %v3996_v12 = vpop.f32.mrb[44].mxu0  ;;  %4095 = vmatprep.mubr.msk.f32.mxu1 %vm1077_vm1, %v1547_v30 }
 0x1cd   : > { %v1556_v34 = vpop.f32.mrb[45].mxu0  ;;  %4096 = vmatmul.mubr.msk.f32.gmra.mrb[42].mxu1 %vm1077_vm1, %v1552_v31  ;;  %v1562_v35 = vadd.f32 %v3996_v12, %v1058_v33 }
 0x1ce   : > { %v1557_v15 = vadd.f32 %v1556_v34, %v1057_v32 }
 0x1d0   : > { %v3999_v38 = vpop.f32.mrb[46].mxu0  ;;  %4098 = vmatprep.mubr.msk.f32.mxu1 %vm1077_vm1, %v1557_v15 }
 0x1d1   : > { %v1566_v39 = vpop.f32.mrb[47].mxu0  ;;  %4099 = vmatmul.mubr.msk.f32.gmra.mrb[44].mxu1 %vm1077_vm1, %v1562_v35  ;;  %v1572_v41 = vadd.f32 %v3999_v38, %v1060_v37 }
 0x1d2   : > { %v1567_v40 = vadd.f32 %v1566_v39, %v1059_v36 }
 0x1d4   : > { %v4002_v44 = vpop.f32.mrb[48].mxu0  ;;  %4101 = vmatprep.mubr.msk.f32.mxu1 %vm1077_vm1, %v1567_v40 }
 0x1d5   : > { %v1576_v45 = vpop.f32.mrb[49].mxu0  ;;  %4102 = vmatmul.mubr.msk.f32.gmra.mrb[46].mxu1 %vm1077_vm1, %v1572_v41  ;;  %v1582_v47 = vadd.f32 %v4002_v44, %v1062_v43 }
 0x1d6   : > { %v1577_v46 = vadd.f32 %v1576_v45, %v1061_v42 }
 0x1d8   : > { %v4005_v50 = vpop.f32.mrb[50].mxu0  ;;  %4104 = vmatprep.mubr.msk.f32.mxu1 %vm1077_vm1, %v1577_v46 }
 0x1d9   : > { %v1586_v51 = vpop.f32.mrb[51].mxu0  ;;  %4105 = vmatmul.mubr.msk.f32.gmra.mrb[48].mxu1 %vm1077_vm1, %v1582_v47  ;;  %v1592_v53 = vadd.f32 %v4005_v50, %v1064_v49 }
 0x1da   : > { %v1587_v52 = vadd.f32 %v1586_v51, %v1063_v48 }
 0x1dc   : > { %v4008_v56 = vpop.f32.mrb[52].mxu0  ;;  %4107 = vmatprep.mubr.msk.f32.mxu1 %vm1077_vm1, %v1587_v52 }
 0x1dd   : > { %v1596_v57 = vpop.f32.mrb[53].mxu0  ;;  %4108 = vmatmul.mubr.msk.f32.gmra.mrb[50].mxu1 %vm1077_vm1, %v1592_v53  ;;  %v1602_v59 = vadd.f32 %v4008_v56, %v1066_v55 }
 0x1de   : > { %v1597_v58 = vadd.f32 %v1596_v57, %v1065_v54 }
 0x1e0   : > { %v4011_v62 = vpop.f32.mrb[54].mxu0  ;;  %4110 = vmatprep.mubr.msk.f32.mxu1 %vm1077_vm1, %v1597_v58  ;;  %v2564_v58 = vld [vmem:[%s4578_s15 + $0x8] sm:$0xff] }
 0x1e1   : > { %v1606_v63 = vpop.f32.mrb[55].mxu0  ;;  %4111 = vmatmul.mubr.msk.f32.gmra.mrb[52].mxu1 %vm1077_vm1, %v1602_v59  ;;  %v1612_v1 = vadd.f32 %v4011_v62, %v1068_v61  ;;  %v5028_v62 = vshrl.u32 %v623_v9, 7 }
 0x1e2   : > { %v1607_v0 = vadd.f32 %v1606_v63, %v1067_v60 }
 0x1e4   : > { %v4014_v4 = vpop.f32.mrb[56].mxu0  ;;  %4113 = vmatprep.mubr.msk.f32.mxu1 %vm1077_vm1, %v1607_v0  ;;  %v2563_v0 = vld [vmem:[%s4578_s15] sm:$0xff] }
 0x1e5   : > { %v1616_v5 = vpop.f32.mrb[57].mxu0  ;;  %4114 = vmatmul.mubr.msk.f32.gmra.mrb[54].mxu1 %vm1077_vm1, %v1612_v1  ;;  %v1622_v7 = vadd.f32 %v4014_v4, %v1070_v3 }
 0x1e6   : > { %v1617_v6 = vadd.f32 %v1616_v5, %v1069_v2 }
 0x1e8   : > { %v4017_v11 = vpop.f32.mrb[58].mxu0  ;;  %4116 = vmatprep.mubr.msk.f32.mxu1 %vm1077_vm1, %v1617_v6 }
 0x1e9   : > { %v1626_v13 = vpop.f32.mrb[59].mxu0  ;;  %4117 = vmatmul.mubr.msk.f32.gmra.mrb[56].mxu1 %vm1077_vm1, %v1622_v7  ;;  %v1632_v16 = vadd.f32 %v4017_v11, %v1072_v10 }
 0x1ea   : > { %v1627_v14 = vadd.f32 %v1626_v13, %v1071_v8  ;;  %v2703_v13 = vsub.s32 1, %v5028_v62 }
 0x1ec   : > { %v4020_v19 = vpop.f32.mrb[60].mxu0  ;;  %4119 = vmatprep.mubr.msk.f32.mxu1 %vm1077_vm1, %v1627_v14 }
 0x1ed   : > { %v1636_v20 = vpop.f32.mrb[61].mxu0  ;;  %4120 = vmatmul.mubr.msk.f32.gmra.mrb[58].mxu1 %vm1077_vm1, %v1632_v16  ;;  %v1642_v22 = vadd.f32 %v4020_v19, %v1074_v18  ;;  %v2566_v16 = vld [vmem:[%s4578_s15 + $0x18] sm:$0xff] }
 0x1ee   : > { %v1637_v21 = vadd.f32 %v1636_v20, %v1073_v17  ;;  %v5050_v20 = vld [vmem:[%s532_s28] sm:$0xf] }
 0x1f0   : > { %v4023_v25 = vpop.f32.mrb[62].mxu0  ;;  %4122 = vmatprep.mubr.msk.f32.mxu1 %vm1077_vm1, %v1637_v21 }
 0x1f1   : > { %v1646_v26 = vpop.f32.mrb[63].mxu0  ;;  %4123 = vmatmul.mubr.msk.f32.gmra.mrb[60].mxu1 %vm1077_vm1, %v1642_v22  ;;  %v1652_v28 = vadd.f32 %v4023_v25, %v1076_v24  ;;  %v2565_v22 = vld [vmem:[%s4578_s15 + $0x10] sm:$0xff] }
 0x1f2   : > { %v1647_v27 = vadd.f32 %v1646_v26, %v1075_v23 }
 0x1f4   : > { %4125 = vmatprep.mubr.msk.f32.mxu1 %vm1077_vm1, %v1647_v27 }
 0x1f5   : > { %4126 = vmatmul.mubr.msk.f32.gmra.mrb[62].mxu1 %vm1077_vm1, %v1652_v28 }
 0x24c   : > { %v4034_v30 = vpop.f32.mrb[0].mxu1 }
 0x24d   : > { %v1930_v31 = vadd.f32 %v4034_v30, %v5007_v29  ;;  %v1924_v32 = vpop.f32.mrb[1].mxu1 }
 0x24e   : > { %v1925_v33 = vadd.f32 %v5007_v29, %v1924_v32 }
 0x24f   : > { %v2308_v12 = vmul.f32 0.70710677, %v1930_v31  ;;  %v2244_v53 = vmul.f32 0.5, %v1930_v31 }
 0x250   : > { %v2307_v34 = vmul.f32 0.70710677, %v1925_v33  ;;  %v4037_v15 = vpop.f32.mrb[2].mxu1  ;;  %v2243_v55 = vmul.f32 0.5, %v1925_v33 }
 0x251   : > { %4274 = verf.f32 %v2308_v12  ;;  %v1940_v35 = vadd.f32 %v4037_v15, %v5007_v29  ;;  %v1934_v36 = vpop.f32.mrb[3].mxu1  ;;  %v5063_v15 = vrot.slane %v5050_v20, %v2703_v13 }
 0x252   : > { %4276 = verf.f32 %v2307_v34  ;;  %v1935_v37 = vadd.f32 %v5007_v29, %v1934_v36  ;;  %v2568_v36 = vld [vmem:[%s4578_s15 + $0x28] sm:$0xff] }
 0x253   : > { %v2310_v38 = vmul.f32 0.70710677, %v1940_v35  ;;  %v2246_v4 = vmul.f32 0.5, %v1940_v35  ;;  %vm2714_vm6 = vcmp.eq.s32.totalorder %v5028_v62, %v5063_v15 }
 0x254   : > { %v2309_v39 = vmul.f32 0.70710677, %v1935_v37  ;;  %v4040_v40 = vpop.f32.mrb[4].mxu1  ;;  %v2245_v5 = vmul.f32 0.5, %v1935_v37 }
 0x255   : > { %4278 = verf.f32 %v2310_v38  ;;  %v1950_v41 = vadd.f32 %v4040_v40, %v5007_v29  ;;  %v1944_v42 = vpop.f32.mrb[5].mxu1 }
 0x256   : > { %4280 = verf.f32 %v2309_v39  ;;  %v1945_v43 = vadd.f32 %v5007_v29, %v1944_v42 }
 0x257   : > { %v2312_v44 = vmul.f32 0.70710677, %v1950_v41  ;;  %v2248_v23 = vmul.f32 0.5, %v1950_v41  ;;  %v2567_v41 = vld [vmem:[%s4578_s15 + $0x20] sm:$0xff] }
 0x258   : > { %v2311_v45 = vmul.f32 0.70710677, %v1945_v43  ;;  %v4043_v46 = vpop.f32.mrb[6].mxu1  ;;  %v2247_v27 = vmul.f32 0.5, %v1945_v43 }
 0x259   : > { %4282 = verf.f32 %v2312_v44  ;;  %v5016_v47 = vadd.f32 %v4043_v46, %v5007_v29  ;;  %v1954_v48 = vpop.f32.mrb[7].mxu1 }
 0x25a   : > { %4284 = verf.f32 %v2311_v45  ;;  %v5019_v49 = vadd.f32 %v5007_v29, %v1954_v48 }
 0x25b   : > { %v4275_v50 = vpop.eup %4274  ;;  %v2314_v51 = vmul.f32 0.70710677, %v5016_v47  ;;  %v2250_v42 = vmul.f32 0.5, %v5016_v47 }
 0x25c   : > { %v4277_v52 = vpop.eup %4276  ;;  %v2436_v54 = vadd.f32 1.0, %v4275_v50  ;;  %v2313_v56 = vmul.f32 0.70710677, %v5019_v49  ;;  %v4046_v57 = vpop.f32.mrb[8].mxu1  ;;  %v2249_v46 = vmul.f32 0.5, %v5019_v49 }
 0x25d   : > { %v2435_v59 = vadd.f32 1.0, %v4277_v52  ;;  %4286 = verf.f32 %v2314_v51  ;;  %v5025_v60 = vadd.f32 %v4046_v57, %v5007_v29  ;;  %v1964_v61 = vpop.f32.mrb[9].mxu1 }
 0x25e   : > { %v2500_v63 = vmul.f32 %v2436_v54, %v2244_v53  ;;  %4288 = verf.f32 %v2313_v56  ;;  %v5032_v1 = vadd.f32 %v5007_v29, %v1964_v61  ;;  %v2570_v56 = vld [vmem:[%s4578_s15 + $0x38] sm:$0xff]  ;;  %v2569_v61 = vld [vmem:[%s4578_s15 + $0x30] sm:$0xff] }
 0x25f   : > { %v4279_v2 = vpop.eup %4278  ;;  %v2499_v3 = vmul.f32 %v2435_v59, %v2243_v55  ;;  %v2316_v6 = vmul.f32 0.70710677, %v5025_v60 }
 0x260   : > { %v4281_v7 = vpop.eup %4280  ;;  %v5035_v8 = vmul.f32 %v2564_v58, %v2500_v63  ;;  %v2438_v9 = vadd.f32 1.0, %v4279_v2  ;;  %v2315_v10 = vmul.f32 0.70710677, %v5032_v1  ;;  %v4049_v11 = vpop.f32.mrb[10].mxu1 }
 0x261   : > { %v5039_v14 = vmul.f32 %v2563_v0, %v2499_v3  ;;  %v2437_v17 = vadd.f32 1.0, %v4281_v7  ;;  %4290 = verf.f32 %v2316_v6  ;;  %v5043_v18 = vadd.f32 %v4049_v11, %v5007_v29  ;;  %v1974_v19 = vpop.f32.mrb[11].mxu1 }
 0x262   : > { %v2502_v21 = vmul.f32 %v2438_v9, %v2246_v4  ;;  %4292 = verf.f32 %v2315_v10  ;;  %v5054_v24 = vadd.f32 %v5007_v29, %v1974_v19  ;;  %v2252_v3 = vmul.f32 0.5, %v5025_v60 }
 0x263   : > { %v4283_v25 = vpop.eup %4282  ;;  %v2501_v26 = vmul.f32 %v2437_v17, %v2245_v5  ;;  %v2318_v28 = vmul.f32 0.70710677, %v5043_v18  ;;  %v4174_v30 = vpack.c.bf16 %v5035_v8, %v5039_v14  ;;  %v4463_v6 = vmov 1.0   ;;  %v2572_v17 = vld [vmem:[%s4578_s15 + $0x48] sm:$0xff] }
 0x264   : > { %v4285_v31 = vpop.eup %4284  ;;  %v5059_v32 = vmul.f32 %v2566_v16, %v2502_v21  ;;  %v2440_v33 = vadd.f32 1.0, %v4283_v25  ;;  %v2317_v12 = vmul.f32 0.70710677, %v5054_v24  ;;  %v4052_v34 = vpop.f32.mrb[12].mxu1  ;;  %3645 = vmatprep.mubr.msk.f32.mxu0 %vm2714_vm6, %v4463_v6  ;;  %v2251_v11 = vmul.f32 0.5, %v5032_v1  ;;  %v2571_v25 = vld [vmem:[%s4578_s15 + $0x40] sm:$0xff] }
 0x265   : > { %v5065_v35 = vmul.f32 %v2565_v22, %v2501_v26  ;;  %v2439_v37 = vadd.f32 1.0, %v4285_v31  ;;  %4294 = verf.f32 %v2318_v28  ;;  %v5069_v38 = vadd.f32 %v4052_v34, %v5007_v29  ;;  %v1984_v39 = vpop.f32.mrb[13].mxu1 }
 0x266   : > { %v2504_v40 = vmul.f32 %v2440_v33, %v2248_v23  ;;  %4296 = verf.f32 %v2317_v12  ;;  %v5074_v43 = vadd.f32 %v5007_v29, %v1984_v39  ;;  %v2711_v1 = vsub.s32 3, %v5028_v62 }
 0x267   : > { %v4287_v44 = vpop.eup %4286  ;;  %v2503_v45 = vmul.f32 %v2439_v37, %v2247_v27  ;;  %v2320_v48 = vmul.f32 0.70710677, %v5069_v38  ;;  %v4178_v50 = vpack.c.bf16 %v5059_v32, %v5065_v35  ;;  %v2254_v31 = vmul.f32 0.5, %v5043_v18 }
 0x268   : > { %v4289_v51 = vpop.eup %4288  ;;  %v5080_v52 = vmul.f32 %v2568_v36, %v2504_v40  ;;  %v2442_v53 = vadd.f32 1.0, %v4287_v44  ;;  %v2319_v47 = vmul.f32 0.70710677, %v5074_v43  ;;  %v4055_v54 = vpop.f32.mrb[14].mxu1  ;;  %v2253_v39 = vmul.f32 0.5, %v5054_v24  ;;  %v2574_v44 = vld [vmem:[%s4578_s15 + $0x58] sm:$0xff] }
 0x269   : > { %v5085_v55 = vmul.f32 %v2567_v41, %v2503_v45  ;;  %v2441_v49 = vadd.f32 1.0, %v4289_v51  ;;  %4298 = verf.f32 %v2320_v48  ;;  %v5089_v57 = vadd.f32 %v4055_v54, %v5007_v29  ;;  %v1994_v58 = vpop.f32.mrb[15].mxu1  ;;  %v2573_v51 = vld [vmem:[%s4578_s15 + $0x50] sm:$0xff] }
 0x26a   : > { %v2506_v59 = vmul.f32 %v2442_v53, %v2250_v42  ;;  %4300 = verf.f32 %v2319_v47  ;;  %v5093_v63 = vadd.f32 %v5007_v29, %v1994_v58  ;;  %v5137_v24 = vrot.slane %v5050_v20, %v2711_v1 }
 0x26b   : > { %v4291_v0 = vpop.eup %4290  ;;  %v2505_v2 = vmul.f32 %v2441_v49, %v2249_v46  ;;  %v2322_v4 = vmul.f32 0.70710677, %v5089_v57  ;;  %v4182_v5 = vpack.c.bf16 %v5080_v52, %v5085_v55 }
 0x26c   : > { %v4293_v7 = vpop.eup %4292  ;;  %v5103_v9 = vmul.f32 %v2570_v56, %v2506_v59  ;;  %v2444_v10 = vadd.f32 1.0, %v4291_v0  ;;  %v2321_v60 = vmul.f32 0.70710677, %v5093_v63  ;;  %v4058_v13 = vpop.f32.mrb[16].mxu1  ;;  %v2256_v56 = vmul.f32 0.5, %v5069_v38 }
 0x26d   : > { %v5107_v16 = vmul.f32 %v2569_v61, %v2505_v2  ;;  %v2443_v19 = vadd.f32 1.0, %v4293_v7  ;;  %4302 = verf.f32 %v2322_v4  ;;  %v5111_v21 = vadd.f32 %v4058_v13, %v5007_v29  ;;  %v2004_v22 = vpop.f32.mrb[17].mxu1 }
 0x26e   : > { %v2508_v23 = vmul.f32 %v2444_v10, %v2252_v3  ;;  %4304 = verf.f32 %v2321_v60  ;;  %v5115_v26 = vadd.f32 %v5007_v29, %v2004_v22  ;;  %v2255_v2 = vmul.f32 0.5, %v5074_v43  ;;  %v2576_v10 = vld [vmem:[%s4578_s15 + $0x68] sm:$0xff] }
 0x26f   : > { %v4295_v27 = vpop.eup %4294  ;;  %v2507_v28 = vmul.f32 %v2443_v19, %v2251_v11  ;;  %v2324_v33 = vmul.f32 0.70710677, %v5111_v21  ;;  %v4186_v12 = vpack.c.bf16 %v5103_v9, %v5107_v16  ;;  %vm2716_vm7 = vcmp.eq.s32.totalorder %v5028_v62, %v5137_v24 }
 0x270   : > { %v4297_v34 = vpop.eup %4296  ;;  %v5122_v36 = vmul.f32 %v2572_v17, %v2508_v23  ;;  %v2446_v37 = vadd.f32 1.0, %v4295_v27  ;;  %v2323_v40 = vmul.f32 0.70710677, %v5115_v26  ;;  %v4061_v41 = vpop.f32.mrb[18].mxu1  ;;  %v2575_v17 = vld [vmem:[%s4578_s15 + $0x60] sm:$0xff]  ;;  %v2258_v23 = vmul.f32 0.5, %v5089_v57  ;;  %3653 = vmatprep.mubr.msk.f32.mxu1 %vm2716_vm7, %v4463_v6 }
 0x271   : > { %v5126_v42 = vmul.f32 %v2571_v25, %v2507_v28  ;;  %v2445_v45 = vadd.f32 1.0, %v4297_v34  ;;  %4306 = verf.f32 %v2324_v33  ;;  %v5130_v18 = vadd.f32 %v4061_v41, %v5007_v29  ;;  %v2014_v46 = vpop.f32.mrb[19].mxu1  ;;  %v2578_v57 = vld [vmem:[%s4578_s15 + $0x78] sm:$0xff] }
 0x272   : > { %v2510_v48 = vmul.f32 %v2446_v37, %v2254_v31  ;;  %4308 = verf.f32 %v2323_v40  ;;  %v5134_v53 = vadd.f32 %v5007_v29, %v2014_v46  ;;  %v2257_v33 = vmul.f32 0.5, %v5093_v63  ;;  %v2577_v46 = vld [vmem:[%s4578_s15 + $0x70] sm:$0xff] }
 0x273   : > { %v4299_v47 = vpop.eup %4298  ;;  %v2509_v54 = vmul.f32 %v2445_v45, %v2253_v39  ;;  %v2326_v49 = vmul.f32 0.70710677, %v5130_v18  ;;  %v4190_v58 = vpack.c.bf16 %v5122_v36, %v5126_v42 }
 0x274   : > { %v4301_v59 = vpop.eup %4300  ;;  %v5143_v61 = vmul.f32 %v2574_v44, %v2510_v48  ;;  %v2448_v0 = vadd.f32 1.0, %v4299_v47  ;;  %v2325_v3 = vmul.f32 0.70710677, %v5134_v53  ;;  %v4064_v4 = vpop.f32.mrb[20].mxu1  ;;  %v2260_v47 = vmul.f32 0.5, %v5111_v21 }
 0x275   : > { %v5147_v7 = vmul.f32 %v2573_v51, %v2509_v54  ;;  %v2447_v11 = vadd.f32 1.0, %v4301_v59  ;;  %4310 = verf.f32 %v2326_v49  ;;  %v5151_v38 = vadd.f32 %v4064_v4, %v5007_v29  ;;  %v2024_v60 = vpop.f32.mrb[21].mxu1 }
 0x276   : > { %v2512_v13 = vmul.f32 %v2448_v0, %v2256_v56  ;;  %4312 = verf.f32 %v2325_v3  ;;  %v5155_v19 = vadd.f32 %v5007_v29, %v2024_v60 }
 0x277   : > { %v4303_v43 = vpop.eup %4302  ;;  %v2511_v22 = vmul.f32 %v2447_v11, %v2255_v2  ;;  %v2328_v25 = vmul.f32 0.70710677, %v5151_v38  ;;  %v4194_v1 = vpack.c.bf16 %v5143_v61, %v5147_v7  ;;  %v2259_v2 = vmul.f32 0.5, %v5115_v26 }
 0x278   : > { %v4305_v27 = vpop.eup %4304  ;;  %v5164_v28 = vmul.f32 %v2576_v10, %v2512_v13  ;;  %v2450_v31 = vadd.f32 1.0, %v4303_v43  ;;  %v2327_v34 = vmul.f32 0.70710677, %v5155_v19  ;;  %v4067_v37 = vpop.f32.mrb[22].mxu1  ;;  %v2580_v13 = vld [vmem:[%s4578_s15 + $0x88] sm:$0xff] }
 0x279   : > { %v5168_v39 = vmul.f32 %v2575_v17, %v2511_v22  ;;  %v2449_v40 = vadd.f32 1.0, %v4305_v27  ;;  %4314 = verf.f32 %v2328_v25  ;;  %v5172_v41 = vadd.f32 %v4067_v37, %v5007_v29  ;;  %v2034_v44 = vpop.f32.mrb[23].mxu1  ;;  %v2579_v22 = vld [vmem:[%s4578_s15 + $0x80] sm:$0xff] }
 0x27a   : > { %v2514_v45 = vmul.f32 %v2450_v31, %v2258_v23  ;;  %4316 = verf.f32 %v2327_v34  ;;  %v5176_v48 = vadd.f32 %v5007_v29, %v2034_v44  ;;  %v2262_v25 = vmul.f32 0.5, %v5130_v18 }
 0x27b   : > { %v4307_v51 = vpop.eup %4306  ;;  %v2513_v63 = vmul.f32 %v2449_v40, %v2257_v33  ;;  %v2330_v54 = vmul.f32 0.70710677, %v5172_v41  ;;  %v4198_v56 = vpack.c.bf16 %v5164_v28, %v5168_v39  ;;  %v2261_v37 = vmul.f32 0.5, %v5134_v53  ;;  %v2598_v39 = vld [vmem:[%s4578_s15 + $0x118] sm:$0xff] }
 0x27c   : > { %v4309_v49 = vpop.eup %4308  ;;  %v5182_v59 = vmul.f32 %v2578_v57, %v2514_v45  ;;  %v2452_v0 = vadd.f32 1.0, %v4307_v51  ;;  %v2329_v3 = vmul.f32 0.70710677, %v5176_v48  ;;  %v4070_v4 = vpop.f32.mrb[24].mxu1 }
 0x27d   : > { %v5186_v10 = vmul.f32 %v2577_v46, %v2513_v63  ;;  %v2451_v11 = vadd.f32 1.0, %v4309_v49  ;;  %4318 = verf.f32 %v2330_v54  ;;  %v5189_v21 = vadd.f32 %v4070_v4, %v5007_v29  ;;  %v2044_v60 = vpop.f32.mrb[25].mxu1  ;;  %v2582_v63 = vld [vmem:[%s4578_s15 + $0x98] sm:$0xff]  ;;  %v2581_v49 = vld [vmem:[%s4578_s15 + $0x90] sm:$0xff] }
 0x27e   : > { %v2516_v17 = vmul.f32 %v2452_v0, %v2260_v47  ;;  %4320 = verf.f32 %v2329_v3  ;;  %v5193_v43 = vadd.f32 %v5007_v29, %v2044_v60 }
 0x27f   : > { %v4311_v23 = vpop.eup %4310  ;;  %v2515_v26 = vmul.f32 %v2451_v11, %v2259_v2  ;;  %v2332_v27 = vmul.f32 0.70710677, %v5189_v21  ;;  %v4202_v31 = vpack.c.bf16 %v5182_v59, %v5186_v10  ;;  %v2264_v2 = vmul.f32 0.5, %v5151_v38 }
 0x280   : > { %v4313_v33 = vpop.eup %4312  ;;  %v2454_v34 = vadd.f32 1.0, %v4311_v23  ;;  %v2331_v57 = vmul.f32 0.70710677, %v5193_v43  ;;  %v4073_v40 = vpop.f32.mrb[26].mxu1  ;;  %v2644_v44 = vmul.f32 %v2580_v13, %v2516_v17  ;;  %v2263_v13 = vmul.f32 0.5, %v5155_v19  ;;  %v2583_v19 = vld [vmem:[%s4578_s15 + $0xa0] sm:$0xff] }
 0x281   : > { %v2453_v45 = vadd.f32 1.0, %v4313_v33  ;;  %4322 = verf.f32 %v2332_v27  ;;  %v5203_v46 = vadd.f32 %v4073_v40, %v5007_v29  ;;  %v2054_v18 = vpop.f32.mrb[27].mxu1  ;;  %v2643_v51 = vmul.f32 %v2579_v22, %v2515_v26  ;;  %v2584_v33 = vld [vmem:[%s4578_s15 + $0xa8] sm:$0xff] }
 0x282   : > { %v2518_v47 = vmul.f32 %v2454_v34, %v2262_v25  ;;  %4324 = verf.f32 %v2331_v57  ;;  %v5207_v54 = vadd.f32 %v5007_v29, %v2054_v18  ;;  %v2699_v57 = vsub.s32 0, %v5028_v62 }
 0x283   : > { %v4315_v0 = vpop.eup %4314  ;;  %v2517_v53 = vmul.f32 %v2453_v45, %v2261_v37  ;;  %v2334_v3 = vmul.f32 0.70710677, %v5203_v46  ;;  %v4172_v4 = vpack.c.bf16 %v2644_v44, %v2643_v51  ;;  %v2266_v45 = vmul.f32 0.5, %v5172_v41 }
 0x284   : > { %v4317_v11 = vpop.eup %4316  ;;  %v2456_v60 = vadd.f32 1.0, %v4315_v0  ;;  %v2333_v17 = vmul.f32 0.70710677, %v5207_v54  ;;  %v4076_v22 = vpop.f32.mrb[28].mxu1  ;;  %v2646_v23 = vmul.f32 %v2582_v63, %v2518_v47 }
 0x285   : > { %v2455_v26 = vadd.f32 1.0, %v4317_v11  ;;  %4326 = verf.f32 %v2334_v3  ;;  %v5215_v25 = vadd.f32 %v4076_v22, %v5007_v29  ;;  %v2064_v27 = vpop.f32.mrb[29].mxu1  ;;  %4173 = vmatprep.subr.bf16.mxu0 %v4172_v4  ;;  %v2645_v38 = vmul.f32 %v2581_v49, %v2517_v53  ;;  %v2586_v3 = vld [vmem:[%s4578_s15 + $0xb8] sm:$0xff] }
 0x286   : > { %v2520_v34 = vmul.f32 %v2456_v60, %v2264_v2  ;;  %4328 = verf.f32 %v2333_v17  ;;  %v5219_v37 = vadd.f32 %v5007_v29, %v2064_v27  ;;  %4175 = vmatpush3.bf16.msra.mxu0 %v4174_v30  ;;  %v2265_v49 = vmul.f32 0.5, %v5176_v48  ;;  %v2585_v48 = vld [vmem:[%s4578_s15 + $0xb0] sm:$0xff] }
 0x287   : > { %v4319_v40 = vpop.eup %4318  ;;  %v2519_v44 = vmul.f32 %v2455_v26, %v2263_v13  ;;  %v2336_v18 = vmul.f32 0.70710677, %v5215_v25  ;;  %v4176_v51 = vpack.c.bf16 %v2646_v23, %v2645_v38  ;;  %v5242_v60 = vrot.slane %v5050_v20, %v2699_v57 }
 0x288   : > { %v4321_v63 = vpop.eup %4320  ;;  %v2458_v47 = vadd.f32 1.0, %v4319_v40  ;;  %v2335_v0 = vmul.f32 0.70710677, %v5219_v37  ;;  %v4079_v8 = vpop.f32.mrb[30].mxu1  ;;  %v2648_v14 = vmul.f32 %v2584_v33, %v2520_v34  ;;  %v2268_v22 = vmul.f32 0.5, %v5189_v21  ;;  %v2588_v40 = vld [vmem:[%s4578_s15 + $0xc8] sm:$0xff] }
 0x289   : > { %v2457_v30 = vadd.f32 1.0, %v4321_v63  ;;  %4330 = verf.f32 %v2336_v18  ;;  %v5231_v53 = vadd.f32 %v4079_v8, %v5007_v29  ;;  %v2074_v2 = vpop.f32.mrb[31].mxu1  ;;  %4177 = vmatprep.subr.bf16.mxu0 %v4176_v51  ;;  %v2647_v41 = vmul.f32 %v2583_v19, %v2519_v44  ;;  %v2587_v18 = vld [vmem:[%s4578_s15 + $0xc0] sm:$0xff] }
 0x28a   : > { %v2522_v4 = vmul.f32 %v2458_v47, %v2266_v45  ;;  %4332 = verf.f32 %v2335_v0  ;;  %v5235_v11 = vadd.f32 %v5007_v29, %v2074_v2  ;;  %4179 = vmatpush3.bf16.msra.mxu0 %v4178_v50  ;;  %v2267_v33 = vmul.f32 0.5, %v5193_v43 }
 0x28b   : > { %v4323_v13 = vpop.eup %4322  ;;  %v2521_v17 = vmul.f32 %v2457_v30, %v2265_v49  ;;  %v2338_v23 = vmul.f32 0.70710677, %v5231_v53  ;;  %v4180_v26 = vpack.c.bf16 %v2648_v14, %v2647_v41  ;;  %v2270_v45 = vmul.f32 0.5, %v5203_v46 }
 0x28c   : > { %v4325_v27 = vpop.eup %4324  ;;  %v2460_v38 = vadd.f32 1.0, %v4323_v13  ;;  %v2337_v32 = vmul.f32 0.70710677, %v5235_v11  ;;  %v4082_v35 = vpop.f32.mrb[32].mxu1  ;;  %v2650_v50 = vmul.f32 %v2586_v3, %v2522_v4  ;;  %v2269_v47 = vmul.f32 0.5, %v5207_v54  ;;  %v2590_v3 = vld [vmem:[%s4578_s15 + $0xd8] sm:$0xff] }
 0x28d   : > { %v2459_v34 = vadd.f32 1.0, %v4325_v27  ;;  %4334 = verf.f32 %v2338_v23  ;;  %v5249_v19 = vadd.f32 %v4082_v35, %v5007_v29  ;;  %v2084_v57 = vpop.f32.mrb[33].mxu1  ;;  %4181 = vmatprep.subr.bf16.mxu0 %v4180_v26  ;;  %v2649_v21 = vmul.f32 %v2585_v48, %v2521_v17  ;;  %v2589_v17 = vld [vmem:[%s4578_s15 + $0xd0] sm:$0xff] }
 0x28e   : > { %v2524_v44 = vmul.f32 %v2460_v38, %v2268_v22  ;;  %4336 = verf.f32 %v2337_v32  ;;  %v5254_v43 = vadd.f32 %v5007_v29, %v2084_v57  ;;  %4183 = vmatpush3.bf16.msra.mxu0 %v4182_v5  ;;  %v2707_v41 = vsub.s32 2, %v5028_v62  ;;  %v2592_v57 = vld [vmem:[%s4578_s15 + $0xe8] sm:$0xff] }
 0x28f   : > { %v4327_v51 = vpop.eup %4326  ;;  %v2523_v63 = vmul.f32 %v2459_v34, %v2267_v33  ;;  %v2340_v49 = vmul.f32 0.70710677, %v5249_v19  ;;  %v4184_v0 = vpack.c.bf16 %v2650_v50, %v2649_v21  ;;  %v2272_v48 = vmul.f32 0.5, %v5215_v25 }
 0x290   : > { %v4329_v8 = vpop.eup %4328  ;;  %v2462_v14 = vadd.f32 1.0, %v4327_v51  ;;  %v2339_v46 = vmul.f32 0.70710677, %v5254_v43  ;;  %v4085_v30 = vpop.f32.mrb[34].mxu1  ;;  %v2652_v2 = vmul.f32 %v2588_v40, %v2524_v44  ;;  %v2271_v26 = vmul.f32 0.5, %v5219_v37 }
 0x291   : > { %v2461_v52 = vadd.f32 1.0, %v4329_v8  ;;  %4338 = verf.f32 %v2340_v49  ;;  %v5265_v55 = vadd.f32 %v4085_v30, %v5007_v29  ;;  %v2094_v5 = vpop.f32.mrb[35].mxu1  ;;  %4185 = vmatprep.subr.bf16.mxu0 %v4184_v0  ;;  %v2651_v54 = vmul.f32 %v2587_v18, %v2523_v63  ;;  %v2594_v30 = vld [vmem:[%s4578_s15 + $0xf8] sm:$0xff] }
 0x292   : > { %v2526_v4 = vmul.f32 %v2462_v14, %v2270_v45  ;;  %4340 = verf.f32 %v2339_v46  ;;  %v5270_v13 = vadd.f32 %v5007_v29, %v2094_v5  ;;  %4187 = vmatpush3.bf16.msra.mxu0 %v4186_v12  ;;  %v5280_v34 = vrot.slane %v5050_v20, %v2707_v41  ;;  %v2591_v20 = vld [vmem:[%s4578_s15 + $0xe0] sm:$0xff] }
 0x293   : > { %v4331_v22 = vpop.eup %4330  ;;  %v2525_v23 = vmul.f32 %v2461_v52, %v2269_v47  ;;  %v2342_v27 = vmul.f32 0.70710677, %v5265_v55  ;;  %v4188_v38 = vpack.c.bf16 %v2652_v2, %v2651_v54  ;;  %v2274_v40 = vmul.f32 0.5, %v5231_v53  ;;  %v2593_v52 = vld [vmem:[%s4578_s15 + $0xf0] sm:$0xff] }
 0x294   : > { %v4333_v33 = vpop.eup %4332  ;;  %v2464_v32 = vadd.f32 1.0, %v4331_v22  ;;  %v2341_v25 = vmul.f32 0.70710677, %v5270_v13  ;;  %v4088_v35 = vpop.f32.mrb[36].mxu1  ;;  %v2654_v50 = vmul.f32 %v2590_v3, %v2526_v4  ;;  %v2273_v51 = vmul.f32 0.5, %v5235_v11 }
 0x295   : > { %v2463_v9 = vadd.f32 1.0, %v4333_v33  ;;  %4342 = verf.f32 %v2342_v27  ;;  %v5283_v16 = vadd.f32 %v4088_v35, %v5007_v29  ;;  %v2104_v12 = vpop.f32.mrb[37].mxu1  ;;  %4189 = vmatprep.subr.bf16.mxu0 %v4188_v38  ;;  %v2653_v37 = vmul.f32 %v2589_v17, %v2525_v23  ;;  %v2596_v23 = vld [vmem:[%s4578_s15 + $0x108] sm:$0xff] }
 0x296   : > { %v2528_v21 = vmul.f32 %v2464_v32, %v2272_v48  ;;  %4344 = verf.f32 %v2341_v25  ;;  %v5288_v44 = vadd.f32 %v5007_v29, %v2104_v12  ;;  %4191 = vmatpush3.bf16.msra.mxu0 %v4190_v58  ;;  %v2276_v53 = vmul.f32 0.5, %v5249_v19  ;;  %v2595_v25 = vld [vmem:[%s4578_s15 + $0x100] sm:$0xff] }
 0x297   : > { %v4335_v45 = vpop.eup %4334  ;;  %v2527_v18 = vmul.f32 %v2463_v9, %v2271_v26  ;;  %v2344_v63 = vmul.f32 0.70710677, %v5283_v16  ;;  %v4192_v47 = vpack.c.bf16 %v2654_v50, %v2653_v37  ;;  %v2275_v41 = vmul.f32 0.5, %v5254_v43 }
 0x298   : > { %v4337_v49 = vpop.eup %4336  ;;  %v2466_v0 = vadd.f32 1.0, %v4335_v45  ;;  %v2343_v8 = vmul.f32 0.70710677, %v5288_v44  ;;  %v4091_v14 = vpop.f32.mrb[38].mxu1  ;;  %v2656_v46 = vmul.f32 %v2592_v57, %v2528_v21  ;;  %vm2713_vm8 = vcmp.eq.s32.totalorder %v5028_v62, %v5242_v60 }
 0x299   : > { %v2465_v36 = vadd.f32 1.0, %v4337_v49  ;;  %4346 = verf.f32 %v2344_v63  ;;  %v5299_v42 = vadd.f32 %v4091_v14, %v5007_v29  ;;  %v2114_v58 = vpop.f32.mrb[39].mxu1  ;;  %4193 = vmatprep.subr.bf16.mxu0 %v4192_v47  ;;  %v2655_v11 = vmul.f32 %v2591_v20, %v2527_v18  ;;  %v2597_v47 = vld [vmem:[%s4578_s15 + $0x110] sm:$0xff] }
 0x29a   : > { %v2530_v2 = vmul.f32 %v2466_v0, %v2274_v40  ;;  %4348 = verf.f32 %v2343_v8  ;;  %v5304_v19 = vadd.f32 %v5007_v29, %v2114_v58  ;;  %4195 = vmatpush3.bf16.msra.mxu0 %v4194_v1  ;;  %v5314_v43 = vadd.s32 8, %v5028_v62 }
 0x29b   : > { %v4339_v5 = vpop.eup %4338  ;;  %v2529_v54 = vmul.f32 %v2465_v36, %v2273_v51  ;;  %v2346_v3 = vmul.f32 0.70710677, %v5299_v42  ;;  %v4196_v4 = vpack.c.bf16 %v2656_v46, %v2655_v11  ;;  %v2278_v22 = vmul.f32 0.5, %v5265_v55  ;;  %v2600_v11 = vld [vmem:[%s4578_s15 + $0x128] sm:$0xff] }
 0x29c   : > { %v4341_v48 = vpop.eup %4340  ;;  %v2468_v17 = vadd.f32 1.0, %v4339_v5  ;;  %v2345_v61 = vmul.f32 0.70710677, %v5304_v19  ;;  %v4094_v7 = vpop.f32.mrb[40].mxu1  ;;  %v2658_v1 = vmul.f32 %v2594_v30, %v2530_v2  ;;  %v2277_v35 = vmul.f32 0.5, %v5270_v13 }
 0x29d   : > { %v2467_v26 = vadd.f32 1.0, %v4341_v48  ;;  %4350 = verf.f32 %v2346_v3  ;;  %v5320_v27 = vadd.f32 %v4094_v7, %v5007_v29  ;;  %v2124_v38 = vpop.f32.mrb[41].mxu1  ;;  %4197 = vmatprep.subr.bf16.mxu0 %v4196_v4  ;;  %v2657_v33 = vmul.f32 %v2593_v52, %v2529_v54  ;;  %v2599_v52 = vld [vmem:[%s4578_s15 + $0x120] sm:$0xff] }
 0x29e   : > { %v2532_v32 = vmul.f32 %v2468_v17, %v2276_v53  ;;  %4352 = verf.f32 %v2345_v61  ;;  %v5325_v55 = vadd.f32 %v5007_v29, %v2124_v38  ;;  %4199 = vmatpush3.bf16.msra.mxu0 %v4198_v56  ;;  %vm2718_vm9 = vcmp.eq.s32.totalorder %v5314_v43, %v5063_v15 }
 0x29f   : > { %v4343_v50 = vpop.eup %4342  ;;  %v2531_v9 = vmul.f32 %v2467_v26, %v2275_v41  ;;  %v2348_v12 = vmul.f32 0.70710677, %v5320_v27  ;;  %v4200_v37 = vpack.c.bf16 %v2658_v1, %v2657_v33  ;;  %v2280_v40 = vmul.f32 0.5, %v5283_v16 }
 0x2a0   : > { %v4345_v57 = vpop.eup %4344  ;;  %v5333_v13 = vmul.f32 %v2596_v23, %v2532_v32  ;;  %v2470_v21 = vadd.f32 1.0, %v4343_v50  ;;  %v2347_v20 = vmul.f32 0.70710677, %v5325_v55  ;;  %v4097_v45 = vpop.f32.mrb[42].mxu1  ;;  %vm2719_vm10 = vcmp.eq.s32.totalorder %v5314_v43, %v5280_v34  ;;  %v2602_v32 = vld [vmem:[%s4578_s15 + $0x138] sm:$0xff] }
 0x2a1   : > { %v5337_v28 = vmul.f32 %v2595_v25, %v2531_v9  ;;  %v2469_v56 = vadd.f32 1.0, %v4345_v57  ;;  %4354 = verf.f32 %v2348_v12  ;;  %v5341_v18 = vadd.f32 %v4097_v45, %v5007_v29  ;;  %v2134_v51 = vpop.f32.mrb[43].mxu1  ;;  %4201 = vmatprep.subr.bf16.mxu0 %v4200_v37  ;;  %v2601_v9 = vld [vmem:[%s4578_s15 + $0x130] sm:$0xff] }
 0x2a2   : > { %v2534_v63 = vmul.f32 %v2470_v21, %v2278_v22  ;;  %4356 = verf.f32 %v2347_v20  ;;  %v5345_v49 = vadd.f32 %v5007_v29, %v2134_v51  ;;  %4203 = vmatpush3.bf16.msra.mxu0 %v4202_v31  ;;  %v2279_v53 = vmul.f32 0.5, %v5288_v44 }
 0x2a3   : > { %v4347_v16 = vpop.eup %4346  ;;  %v2533_v0 = vmul.f32 %v2469_v56, %v2277_v35  ;;  %v2350_v8 = vmul.f32 0.70710677, %v5341_v18  ;;  %v4206_v14 = vpack.c.bf16 %v5333_v13, %v5337_v28  ;;  %vm2717_vm11 = vcmp.eq.s32.totalorder %v5314_v43, %v5242_v60 }
 0x2a4   : > { %v4349_v46 = vpop.eup %4348  ;;  %v5356_v36 = vmul.f32 %v2598_v39, %v2534_v63  ;;  %v2472_v58 = vadd.f32 1.0, %v4347_v16  ;;  %v2349_v59 = vmul.f32 0.70710677, %v5345_v49  ;;  %v4100_v10 = vpop.f32.mrb[44].mxu1  ;;  %v5380_v54 = vadd.s32 16, %v5028_v62 }
 0x2a5   : > { %v5361_v31 = vmul.f32 %v2597_v47, %v2533_v0  ;;  %v2471_v44 = vadd.f32 1.0, %v4349_v46  ;;  %4358 = verf.f32 %v2350_v8  ;;  %v5365_v30 = vadd.f32 %v4100_v10, %v5007_v29  ;;  %v2144_v2 = vpop.f32.mrb[45].mxu1  ;;  %3646 = vmatmul.mubr.msk.f32.vlgmr.msra.gmra.mrb[64].mxu0 %vm2713_vm8, %v4463_v6  ;;  %v2603_v46 = vld [vmem:[%s4578_s15 + $0x140] sm:$0xff] }
 0x2a6   : > { %v2536_v41 = vmul.f32 %v2472_v58, %v2280_v40  ;;  %4360 = verf.f32 %v2349_v59  ;;  %v5373_v5 = vadd.f32 %v5007_v29, %v2144_v2  ;;  %3647 = vmatprep.mubr.msk.f32.mxu0 %vm2718_vm9, %v4463_v6  ;;  %v2282_v48 = vmul.f32 0.5, %v5299_v42 }
 0x2a7   : > { %v4351_v3 = vpop.eup %4350  ;;  %v2535_v4 = vmul.f32 %v2471_v44, %v2279_v53  ;;  %v2352_v17 = vmul.f32 0.70710677, %v5365_v30  ;;  %v4210_v22 = vpack.c.bf16 %v5356_v36, %v5361_v31  ;;  %v2281_v23 = vmul.f32 0.5, %v5304_v19  ;;  %v2620_v31 = vld [vmem:[%s4578_s15 + $0x1c8] sm:$0xff] }
 0x2a8   : > { %v4353_v61 = vpop.eup %4352  ;;  %v5386_v7 = vmul.f32 %v2600_v11, %v2536_v41  ;;  %v2474_v1 = vadd.f32 1.0, %v4351_v3  ;;  %v2351_v26 = vmul.f32 0.70710677, %v5373_v5  ;;  %v4103_v38 = vpop.f32.mrb[46].mxu1  ;;  %vm2722_vm12 = vcmp.eq.s32.totalorder %v5380_v54, %v5063_v15 }
 0x2a9   : > { %v5390_v33 = vmul.f32 %v2599_v52, %v2535_v4  ;;  %v2473_v25 = vadd.f32 1.0, %v4353_v61  ;;  %4362 = verf.f32 %v2352_v17  ;;  %v5394_v42 = vadd.f32 %v4103_v38, %v5007_v29  ;;  %v2154_v35 = vpop.f32.mrb[47].mxu1  ;;  %3648 = vmatmul.mubr.msk.f32.gmra.mrb[66].mxu0 %vm2717_vm11, %v4463_v6  ;;  %v2606_v17 = vld [vmem:[%s4578_s15 + $0x158] sm:$0xff]  ;;  %v2605_v38 = vld [vmem:[%s4578_s15 + $0x150] sm:$0xff] }
 0x2aa   : > { %v2538_v50 = vmul.f32 %v2474_v1, %v2282_v48  ;;  %4364 = verf.f32 %v2351_v26  ;;  %v5402_v19 = vadd.f32 %v5007_v29, %v2154_v35  ;;  %v2284_v57 = vmul.f32 0.5, %v5320_v27  ;;  %3649 = vmatprep.mubr.msk.f32.mxu0 %vm2722_vm12, %v4463_v6  ;;  %v2604_v27 = vld [vmem:[%s4578_s15 + $0x148] sm:$0xff] }
 0x2ab   : > { %v4355_v12 = vpop.eup %4354  ;;  %v2537_v37 = vmul.f32 %v2473_v25, %v2281_v23  ;;  %v2354_v21 = vmul.f32 0.70710677, %v5394_v42  ;;  %v4214_v40 = vpack.c.bf16 %v5386_v7, %v5390_v33  ;;  %v2283_v56 = vmul.f32 0.5, %v5325_v55  ;;  %v2621_v7 = vld [vmem:[%s4578_s15 + $0x1d0] sm:$0xff] }
 0x2ac   : > { %v4357_v20 = vpop.eup %4356  ;;  %v5411_v45 = vmul.f32 %v2602_v32, %v2538_v50  ;;  %v2476_v39 = vadd.f32 1.0, %v4355_v12  ;;  %v2353_v51 = vmul.f32 0.70710677, %v5402_v19  ;;  %v4106_v63 = vpop.f32.mrb[48].mxu1  ;;  %v2286_v10 = vmul.f32 0.5, %v5341_v18 }
 0x2ad   : > { %v5415_v47 = vmul.f32 %v2601_v9, %v2537_v37  ;;  %v2475_v16 = vadd.f32 1.0, %v4357_v20  ;;  %4366 = verf.f32 %v2354_v21  ;;  %v5419_v0 = vadd.f32 %v4106_v63, %v5007_v29  ;;  %v2164_v53 = vpop.f32.mrb[49].mxu1  ;;  %v5439_v18 = vld [vmem:[%s5734_s6] ss:$0 sm:$0xff] }
 0x2ae   : > { %v2540_v8 = vmul.f32 %v2476_v39, %v2284_v57  ;;  %4368 = verf.f32 %v2353_v51  ;;  %v5423_v58 = vadd.f32 %v5007_v29, %v2164_v53  ;;  %v2285_v3 = vmul.f32 0.5, %v5345_v49  ;;  %v2607_v53 = vld [vmem:[%s4578_s15 + $0x160] sm:$0xff] }
 0x2af   : > { %v4359_v55 = vpop.eup %4358  ;;  %v2539_v59 = vmul.f32 %v2475_v16, %v2283_v56  ;;  %v2356_v11 = vmul.f32 0.70710677, %v5419_v0  ;;  %v4218_v44 = vpack.c.bf16 %v5411_v45, %v5415_v47  ;;  %vm2721_vm13 = vcmp.eq.s32.totalorder %v5380_v54, %v5242_v60  ;;  %v2623_v45 = vld [vmem:[%s4578_s15 + $0x1e0] sm:$0xff] }
 0x2b0   : > { %v4361_v2 = vpop.eup %4360  ;;  %v5429_v41 = vmul.f32 %v2604_v27, %v2540_v8  ;;  %v2478_v52 = vadd.f32 1.0, %v4359_v55  ;;  %v2355_v4 = vmul.f32 0.70710677, %v5423_v58  ;;  %v4109_v29 = vpop.f32.mrb[50].mxu1  ;;  %v2288_v35 = vmul.f32 0.5, %v5365_v30  ;;  %3650 = vmatmul.mubr.msk.f32.gmra.mrb[68].mxu0 %vm2721_vm13, %v4463_v6  ;;  %v2608_v30 = vld [vmem:[%s4578_s15 + $0x168] sm:$0xff] }
 0x2b1   : > { %v5433_v48 = vmul.f32 %v2603_v46, %v2539_v59  ;;  %v2477_v61 = vadd.f32 1.0, %v4361_v2  ;;  %4370 = verf.f32 %v2356_v11  ;;  %v5442_v1 = vadd.f32 %v5439_v18, %v4109_v29  ;;  %v2174_v23 = vpop.f32.mrb[51].mxu1 }
 0x2b2   : > { %v2542_v26 = vmul.f32 %v2478_v52, %v2286_v10  ;;  %4372 = verf.f32 %v2355_v4  ;;  %v5446_v49 = vadd.f32 %v5439_v18, %v2174_v23  ;;  %v2287_v21 = vmul.f32 0.5, %v5373_v5 }
 0x2b3   : > { %v4363_v32 = vpop.eup %4362  ;;  %v2541_v25 = vmul.f32 %v2477_v61, %v2285_v3  ;;  %v2358_v50 = vmul.f32 0.70710677, %v5442_v1  ;;  %v4222_v9 = vpack.c.bf16 %v5429_v41, %v5433_v48  ;;  %vm2723_vm14 = vcmp.eq.s32.totalorder %v5380_v54, %v5280_v34  ;;  %v2610_v61 = vld [vmem:[%s4578_s15 + $0x178] sm:$0xff]  ;;  %v2625_v41 = vld [vmem:[%s4578_s15 + $0x1f0] sm:$0xff] }
 0x2b4   : > { %v4365_v12 = vpop.eup %4364  ;;  %v5455_v37 = vmul.f32 %v2606_v17, %v2542_v26  ;;  %v2480_v57 = vadd.f32 1.0, %v4363_v32  ;;  %v2357_v20 = vmul.f32 0.70710677, %v5446_v49  ;;  %v4112_v39 = vpop.f32.mrb[52].mxu1  ;;  %v2290_v55 = vmul.f32 0.5, %v5394_v42  ;;  %v2609_v32 = vld [vmem:[%s4578_s15 + $0x170] sm:$0xff] }
 0x2b5   : > { %v5459_v56 = vmul.f32 %v2605_v38, %v2541_v25  ;;  %v2479_v51 = vadd.f32 1.0, %v4365_v12  ;;  %4374 = verf.f32 %v2358_v50  ;;  %v5463_v63 = vadd.f32 %v5439_v18, %v4112_v39  ;;  %v2184_v27 = vpop.f32.mrb[53].mxu1 }
 0x2b6   : > { %v2544_v16 = vmul.f32 %v2480_v57, %v2288_v35  ;;  %4376 = verf.f32 %v2357_v20  ;;  %v5467_v8 = vadd.f32 %v5439_v18, %v2184_v27  ;;  %v2289_v3 = vmul.f32 0.5, %v5402_v19 }
 0x2b7   : > { %v4367_v5 = vpop.eup %4366  ;;  %v2543_v46 = vmul.f32 %v2479_v51, %v2287_v21  ;;  %v2360_v59 = vmul.f32 0.70710677, %v5463_v63  ;;  %v4226_v10 = vpack.c.bf16 %v5455_v37, %v5459_v56  ;;  %v5490_v19 = vadd.s32 24, %v5028_v62 }
 0x2b8   : > { %v4369_v11 = vpop.eup %4368  ;;  %v5475_v2 = vmul.f32 %v2608_v30, %v2544_v16  ;;  %v2482_v52 = vadd.f32 1.0, %v4367_v5  ;;  %v2359_v4 = vmul.f32 0.70710677, %v5467_v8  ;;  %v4115_v29 = vpop.f32.mrb[54].mxu1  ;;  %v2292_v12 = vmul.f32 0.5, %v5419_v0 }
 0x2b9   : > { %v5479_v17 = vmul.f32 %v2607_v53, %v2543_v46  ;;  %v2481_v23 = vadd.f32 1.0, %v4369_v11  ;;  %4378 = verf.f32 %v2360_v59  ;;  %v5483_v42 = vadd.f32 %v5439_v18, %v4115_v29  ;;  %v2194_v26 = vpop.f32.mrb[55].mxu1 }
 0x2ba   : > { %v2546_v38 = vmul.f32 %v2482_v52, %v2290_v55  ;;  %4380 = verf.f32 %v2359_v4  ;;  %v5487_v25 = vadd.f32 %v5439_v18, %v2194_v26  ;;  %v2291_v51 = vmul.f32 0.5, %v5423_v58  ;;  %v2612_v55 = vld [vmem:[%s4578_s15 + $0x188] sm:$0xff]  ;;  %v2611_v52 = vld [vmem:[%s4578_s15 + $0x180] sm:$0xff] }
 0x2bb   : > { %v4371_v35 = vpop.eup %4370  ;;  %v2545_v50 = vmul.f32 %v2481_v23, %v2289_v3  ;;  %v2362_v57 = vmul.f32 0.70710677, %v5483_v42  ;;  %v4230_v21 = vpack.c.bf16 %v5475_v2, %v5479_v17  ;;  %vm2726_vm15 = vcmp.eq.s32.totalorder %v5490_v19, %v5063_v15 }
 0x2bc   : > { %v4373_v20 = vpop.eup %4372  ;;  %v5496_v39 = vmul.f32 %v2610_v61, %v2546_v38  ;;  %v2484_v30 = vadd.f32 1.0, %v4371_v35  ;;  %v2361_v27 = vmul.f32 0.70710677, %v5487_v25  ;;  %v4118_v16 = vpop.f32.mrb[56].mxu1  ;;  %v2294_v4 = vmul.f32 0.5, %v5442_v1  ;;  %3651 = vmatprep.mubr.msk.f32.mxu0 %vm2726_vm15, %v4463_v6 }
 0x2bd   : > { %v5500_v53 = vmul.f32 %v2609_v32, %v2545_v50  ;;  %v2483_v5 = vadd.f32 1.0, %v4373_v20  ;;  %4382 = verf.f32 %v2362_v57  ;;  %v5503_v0 = vadd.f32 %v5439_v18, %v4118_v16  ;;  %v2204_v46 = vpop.f32.mrb[57].mxu1  ;;  %v2614_v20 = vld [vmem:[%s4578_s15 + $0x198] sm:$0xff] }
 0x2be   : > { %v2548_v59 = vmul.f32 %v2484_v30, %v2292_v12  ;;  %4384 = verf.f32 %v2361_v27  ;;  %v5507_v11 = vadd.f32 %v5439_v18, %v2204_v46  ;;  %v2293_v38 = vmul.f32 0.5, %v5446_v49  ;;  %v2613_v27 = vld [vmem:[%s4578_s15 + $0x190] sm:$0xff] }
 0x2bf   : > { %v4375_v58 = vpop.eup %4374  ;;  %v2547_v3 = vmul.f32 %v2483_v5, %v2291_v51  ;;  %v2364_v29 = vmul.f32 0.70710677, %v5503_v0  ;;  %v4234_v61 = vpack.c.bf16 %v5496_v39, %v5500_v53  ;;  %v2296_v5 = vmul.f32 0.5, %v5463_v63 }
 0x2c0   : > { %v4377_v23 = vpop.eup %4376  ;;  %v2486_v26 = vadd.f32 1.0, %v4375_v58  ;;  %v2363_v32 = vmul.f32 0.70710677, %v5507_v11  ;;  %v4121_v15 = vpop.f32.mrb[58].mxu1  ;;  %v2676_v35 = vmul.f32 %v2612_v55, %v2548_v59  ;;  %vm2725_vm0 = vcmp.eq.s32.totalorder %v5490_v19, %v5242_v60 }
 0x2c1   : > { %v2485_v50 = vadd.f32 1.0, %v4377_v23  ;;  %4386 = verf.f32 %v2364_v29  ;;  %v5520_v1 = vadd.f32 %v5439_v18, %v4121_v15  ;;  %v2214_v12 = vpop.f32.mrb[59].mxu1  ;;  %v2675_v57 = vmul.f32 %v2611_v52, %v2547_v3  ;;  %3652 = vmatmul.mubr.msk.f32.gmra.mrb[70].mxu0 %vm2725_vm0, %v4463_v6 }
 0x2c2   : > { %v2550_v30 = vmul.f32 %v2486_v26, %v2294_v4  ;;  %4388 = verf.f32 %v2363_v32  ;;  %v5524_v51 = vadd.f32 %v5439_v18, %v2214_v12  ;;  %v2295_v52 = vmul.f32 0.5, %v5467_v8  ;;  %v2616_v32 = vld [vmem:[%s4578_s15 + $0x1a8] sm:$0xff]  ;;  %v2615_v8 = vld [vmem:[%s4578_s15 + $0x1a0] sm:$0xff] }
 0x2c3   : > { %v4379_v16 = vpop.eup %4378  ;;  %v2549_v49 = vmul.f32 %v2485_v50, %v2293_v38  ;;  %v2366_v46 = vmul.f32 0.70710677, %v5520_v1  ;;  %v4204_v55 = vpack.c.bf16 %v2676_v35, %v2675_v57  ;;  %v2298_v57 = vmul.f32 0.5, %v5483_v42 }
 0x2c4   : > { %v4381_v59 = vpop.eup %4380  ;;  %v2488_v58 = vadd.f32 1.0, %v4379_v16  ;;  %v2365_v3 = vmul.f32 0.70710677, %v5524_v51  ;;  %v4124_v4 = vpop.f32.mrb[60].mxu1  ;;  %v2678_v29 = vmul.f32 %v2614_v20, %v2550_v30  ;;  %v2297_v13 = vmul.f32 0.5, %v5487_v25  ;;  %v2617_v25 = vld [vmem:[%s4578_s15 + $0x1b0] sm:$0xff] }
 0x2c5   : > { %v2487_v23 = vadd.f32 1.0, %v4381_v59  ;;  %4390 = verf.f32 %v2366_v46  ;;  %v5532_v26 = vadd.f32 %v5439_v18, %v4124_v4  ;;  %v2224_v38 = vpop.f32.mrb[61].mxu1  ;;  %4205 = vmatprep.subr.bf16.mxu1 %v4204_v55  ;;  %v2677_v63 = vmul.f32 %v2613_v27, %v2549_v49  ;;  %v2618_v55 = vld [vmem:[%s4578_s15 + $0x1b8] sm:$0xff] }
 0x2c6   : > { %v2552_v15 = vmul.f32 %v2488_v58, %v2296_v5  ;;  %4392 = verf.f32 %v2365_v3  ;;  %v5536_v35 = vadd.f32 %v5439_v18, %v2224_v38  ;;  %4207 = vmatpush3.bf16.msra.mxu1 %v4206_v14  ;;  %v2300_v38 = vmul.f32 0.5, %v5503_v0 }
 0x2c7   : > { %v4383_v50 = vpop.eup %4382  ;;  %v2551_v12 = vmul.f32 %v2487_v23, %v2295_v52  ;;  %v2368_v20 = vmul.f32 0.70710677, %v5532_v26  ;;  %v4208_v30 = vpack.c.bf16 %v2678_v29, %v2677_v63  ;;  %vm2715_vm2 = vcmp.eq.s32.totalorder %v5028_v62, %v5280_v34 }
 0x2c8   : > { %v4385_v27 = vpop.eup %4384  ;;  %v2490_v16 = vadd.f32 1.0, %v4383_v50  ;;  %v2367_v28 = vmul.f32 0.70710677, %v5536_v35  ;;  %v4127_v14 = vpop.f32.mrb[62].mxu1  ;;  %v2680_v49 = vmul.f32 %v2616_v32, %v2552_v15  ;;  %v2619_v50 = vld [vmem:[%s4578_s15 + $0x1c0] sm:$0xff]  ;;  %vm2720_vm3 = vcmp.eq.s32.totalorder %v5314_v43, %v5137_v24 }
 0x2c9   : > { %v2489_v60 = vadd.f32 1.0, %v4385_v27  ;;  %4394 = verf.f32 %v2368_v20  ;;  %v2240_v5 = vadd.f32 %v5439_v18, %v4127_v14  ;;  %v2234_v42 = vpop.f32.mrb[63].mxu1  ;;  %4209 = vmatprep.subr.bf16.mxu1 %v4208_v30  ;;  %v2679_v46 = vmul.f32 %v2615_v8, %v2551_v12  ;;  %v2622_v14 = vld [vmem:[%s4578_s15 + $0x1d8] sm:$0xff] }
 0x2ca   : > { %v2554_v59 = vmul.f32 %v2490_v16, %v2298_v57  ;;  %4396 = verf.f32 %v2367_v28  ;;  %v2235_v58 = vadd.f32 %v5439_v18, %v2234_v42  ;;  %4211 = vmatpush3.bf16.msra.mxu1 %v4210_v22  ;;  %v2299_v8 = vmul.f32 0.5, %v5507_v11 }
 0x2cb   : > { %v4387_v52 = vpop.eup %4386  ;;  %v2553_v3 = vmul.f32 %v2489_v60, %v2297_v13  ;;  %v2370_v4 = vmul.f32 0.70710677, %v2240_v5  ;;  %v4212_v29 = vpack.c.bf16 %v2680_v49, %v2679_v46  ;;  %v2302_v11 = vmul.f32 0.5, %v5520_v1 }
 0x2cc   : > { %v4389_v23 = vpop.eup %4388  ;;  %v2492_v63 = vadd.f32 1.0, %v4387_v52  ;;  %v2369_v32 = vmul.f32 0.70710677, %v2235_v58  ;;  %v2682_v15 = vmul.f32 %v2618_v55, %v2554_v59  ;;  %v2301_v16 = vmul.f32 0.5, %v5524_v51  ;;  %v2624_v52 = vld [vmem:[%s4578_s15 + $0x1e8] sm:$0xff] }
 0x2cd   : > { %v2491_v18 = vadd.f32 1.0, %v4389_v23  ;;  %4398 = verf.f32 %v2370_v4  ;;  %4213 = vmatprep.subr.bf16.mxu1 %v4212_v29  ;;  %v2681_v36 = vmul.f32 %v2617_v25, %v2553_v3  ;;  %v2304_v42 = vmul.f32 0.5, %v5532_v26 }
 0x2ce   : > { %v2556_v22 = vmul.f32 %v2492_v63, %v2300_v38  ;;  %4400 = verf.f32 %v2369_v32  ;;  %4215 = vmatpush3.bf16.msra.mxu1 %v4214_v40  ;;  %v2303_v55 = vmul.f32 0.5, %v5536_v35  ;;  %v2306_v29 = vmul.f32 0.5, %v2240_v5 }
 0x2cf   : > { %v4391_v0 = vpop.eup %4390  ;;  %v2555_v12 = vmul.f32 %v2491_v18, %v2299_v8  ;;  %v4216_v57 = vpack.c.bf16 %v2682_v15, %v2681_v36  ;;  %v2305_v35 = vmul.f32 0.5, %v2235_v58  ;;  %v2626_v15 = vld [vmem:[%s4578_s15 + $0x1f8] sm:$0xff]  ;;  %vm2724_vm4 = vcmp.eq.s32.totalorder %v5380_v54, %v5137_v24 }
 0x2d0   : > { %v4393_v20 = vpop.eup %4392  ;;  %v2494_v30 = vadd.f32 1.0, %v4391_v0  ;;  %v2684_v27 = vmul.f32 %v2620_v31, %v2556_v22  ;;  %vm2728_vm5 = vcmp.eq.s32.totalorder %v5490_v19, %v5137_v24  ;;  %vm2727_vm6 = vcmp.eq.s32.totalorder %v5490_v19, %v5280_v34  ;;  %v2729_v22 = vld [vmem:[#allocation2] sm:$0xff] }
 0x2d1   : > { %v2493_v13 = vadd.f32 1.0, %v4393_v20  ;;  %4217 = vmatprep.subr.bf16.mxu1 %v4216_v57  ;;  %v2683_v28 = vmul.f32 %v2619_v50, %v2555_v12  ;;  %v2730_v12 = vld [vmem:[#allocation2 + $0x8] sm:$0xff] }
 0x2d2   : > { %v2558_v49 = vmul.f32 %v2494_v30, %v2302_v11  ;;  %4219 = vmatpush3.bf16.msra.mxu1 %v4218_v44 }
 0x2d3   : > { %v4395_v33 = vpop.eup %4394  ;;  %v2557_v40 = vmul.f32 %v2493_v13, %v2301_v16  ;;  %v4220_v60 = vpack.c.bf16 %v2684_v27, %v2683_v28  ;;  %v2731_v16 = vld [vmem:[#allocation2 + $0x10] sm:$0xff] }
 0x2d4   : > { %v4397_v1 = vpop.eup %4396  ;;  %v2496_v46 = vadd.f32 1.0, %v4395_v33  ;;  %v2686_v51 = vmul.f32 %v2622_v14, %v2558_v49  ;;  %v2732_v33 = vld [vmem:[#allocation2 + $0x18] sm:$0xff] }
 0x2d5   : > { %v2495_v59 = vadd.f32 1.0, %v4397_v1  ;;  %4221 = vmatprep.subr.bf16.mxu1 %v4220_v60  ;;  %v2685_v25 = vmul.f32 %v2621_v7, %v2557_v40  ;;  %v2951_v1 = vld [vmem:[%s5735_s7] sm:$0xff] (!%p3661_p6) }
 0x2d6   : > { %v2560_v3 = vmul.f32 %v2496_v46, %v2304_v42  ;;  %4223 = vmatpush3.bf16.msra.mxu1 %v4222_v9  ;;  %v2952_v42 = vld [vmem:[%s5735_s7 + $0x8] sm:$0xff] (!%p3661_p6)  ;;  %v2953_v46 = vld [vmem:[%s5735_s7 + $0x10] sm:$0xff] (!%p3661_p6) }
 0x2d7   : > { %v4399_v47 = vpop.eup %4398  ;;  %v2559_v44 = vmul.f32 %v2495_v59, %v2303_v55  ;;  %v4224_v4 = vpack.c.bf16 %v2686_v51, %v2685_v25  ;;  %v4236_v51 = vpack.c.bf16 (!%p3661_p6), %v2952_v42, %v2951_v1  ;;  %v2954_v55 = vld [vmem:[%s5735_s7 + $0x18] sm:$0xff] (!%p3661_p6) }
 0x2d8   : > { %v4401_v26 = vpop.eup %4400  ;;  %v2498_v23 = vadd.f32 1.0, %v4399_v47  ;;  %v2688_v38 = vmul.f32 %v2624_v52, %v2560_v3  ;;  %v4240_v25 = vpack.c.bf16 (!%p3661_p6), %v2954_v55, %v2953_v46  ;;  %v3143_v47 = vld [vmem:[%s5739_s11] sm:$0xff] (!%p3661_p6) }
 0x2d9   : > { %v2497_v63 = vadd.f32 1.0, %v4401_v26  ;;  %4225 = vmatprep.subr.bf16.mxu1 %v4224_v4  ;;  %v2687_v32 = vmul.f32 %v2623_v45, %v2559_v44  ;;  %4237 = vmatprep.subr.bf16.mxu0 (!%p3661_p6), %v4236_v51  ;;  %v3144_v44 = vld [vmem:[%s5739_s11 + $0x8] sm:$0xff] (!%p3661_p6)  ;;  %v3145_v4 = vld [vmem:[%s5739_s11 + $0x10] sm:$0xff] (!%p3661_p6)  ;;  %v3668_v55 = vld [vmem:[%s5738_s10] ss:$0 sm:$0xff] (!%p3661_p6) }
 0x2da   : > { %v2562_v8 = vmul.f32 %v2498_v23, %v2306_v29  ;;  %4227 = vmatpush3.bf16.msra.mxu1 %v4226_v10  ;;  %4239 = vmatpush3.bf16.msra.mxu0 (!%p3661_p6), %v4236_v51  ;;  %v4244_v26 = vpack.c.bf16 (!%p3661_p6), %v3144_v44, %v3143_v47  ;;  %v3146_v29 = vld [vmem:[%s5739_s11 + $0x18] sm:$0xff] (!%p3661_p6) }
 0x2db   : > { %v2561_v48 = vmul.f32 %v2497_v63, %v2305_v35  ;;  %v4228_v9 = vpack.c.bf16 %v2688_v38, %v2687_v32  ;;  %4241 = vmatprep.subr.bf16.mxu0 (!%p3661_p6), %v4240_v25  ;;  %v4248_v23 = vpack.c.bf16 (!%p3661_p6), %v3146_v29, %v3145_v4  ;;  %v3662_v38 = vld [vmem:[%s5736_s8] ss:$0 sm:$0xff] (!%p3661_p6) }
 0x2dc   : > { %v2690_v18 = vmul.f32 %v2626_v15, %v2562_v8 }
 0x2dd   : > { %4229 = vmatprep.subr.bf16.mxu1 %v4228_v9  ;;  %v2689_v36 = vmul.f32 %v2625_v41, %v2561_v48 }
 0x2de   : > { %4231 = vmatpush3.bf16.msra.mxu1 %v4230_v21  ;;  %4243 = vmatpush3.bf16.msra.mxu0 (!%p3661_p6), %v4240_v25 }
 0x2df   : > { %v4232_v5 = vpack.c.bf16 %v2690_v18, %v2689_v36 }
 0x2e1   : > { %4233 = vmatprep.subr.bf16.mxu1 %v4232_v5 }
 0x2e2   : > { %4235 = vmatpush3.bf16.msra.mxu1 %v4234_v61 }
 0x2e3   : > { %4245 = vmatprep.subr.bf16.mxu1 (!%p3661_p6), %v4244_v26 }
 0x2e5   : > { %3654 = vmatmul.mubr.msk.f32.vlgmr.msra.gmra.mrb[64].mxu1 %vm2715_vm2, %v4463_v6 }
 0x2e6   : > { %3655 = vmatprep.mubr.msk.f32.mxu1 %vm2720_vm3, %v4463_v6  ;;  %4247 = vmatpush3.bf16.msra.mxu1 (!%p3661_p6), %v4244_v26 }
 0x2e7   : > { %4249 = vmatprep.subr.bf16.mxu1 (!%p3661_p6), %v4248_v23 }
 0x2e9   : > { %3656 = vmatmul.mubr.msk.f32.gmra.mrb[66].mxu1 %vm2719_vm10, %v4463_v6 }
 0x2ea   : > { %3657 = vmatprep.mubr.msk.f32.mxu1 %vm2724_vm4, %v4463_v6  ;;  %4251 = vmatpush3.bf16.msra.mxu1 (!%p3661_p6), %v4248_v23 }
 0x2ed   : > { %3658 = vmatmul.mubr.msk.f32.gmra.mrb[68].mxu1 %vm2723_vm14, %v4463_v6 }
 0x2ee   : > { %3659 = vmatprep.mubr.msk.f32.mxu1 %vm2728_vm5, %v4463_v6 }
 0x2f1   : > { %3660 = vmatmul.mubr.msk.f32.gmra.mrb[70].mxu1 %vm2727_vm6, %v4463_v6 }
 0x378   : > { %v3848_v62 = vpop.f32.mrb[64].mxu0 }
 0x379   : > { %v3849_v43 = vpop.f32.mrb[65].mxu0 }
 0x37a   : > { %v3850_v37 = vadd.f32 %v3849_v43, %v3848_v62 }
 0x37c   : > { %v3851_v56 = vpop.f32.mrb[66].mxu0 }
 0x37d   : > { %v3852_v10 = vpop.f32.mrb[67].mxu0 }
 0x37e   : > { %v3853_v2 = vadd.f32 %v3852_v10, %v3851_v56 }
 0x383   : > { %v3854_v17 = vpop.f32.mrb[68].mxu0 }
 0x384   : > { %v3855_v24 = vpop.f32.mrb[69].mxu0 }
 0x385   : > { %v3856_v21 = vadd.f32 %v3855_v24, %v3854_v17 }
 0x394   : > { %v3857_v39 = vpop.f32.mrb[70].mxu0 }
 0x395   : > { %v3858_v53 = vpop.f32.mrb[71].mxu0 }
 0x396   : > { %v3859_v54 = vadd.f32 %v3858_v53, %v3857_v39 }
 0x3b8   : > { %v3892_v61 = vpop.f32.mrb[64].mxu1 }
 0x3b9   : > { %v3893_v58 = vpop.f32.mrb[65].mxu1 }
 0x3ba   : > { %v3894_v31 = vadd.f32 %v3893_v58, %v3892_v61 }
 0x3bc   : > { %v2917_v50 = vadd.f32 %v3894_v31, %v3850_v37  ;;  %v3895_v34 = vpop.f32.mrb[66].mxu1 }
 0x3bd   : > { %v3896_v19 = vpop.f32.mrb[67].mxu1 }
 0x3be   : > { %v2935_v6 = vadd.f32 %v2917_v50, %v2729_v22  ;;  %v3897_v0 = vadd.f32 %v3896_v19, %v3895_v34 }
 0x3c0   : > { %2939 = vst.msk [vmem:[#allocation2] sm:$0xff] %vm1077_vm1, %v2935_v6  ;;  %v2922_v57 = vadd.f32 %v3897_v0, %v3853_v2  ;;  %v3898_v20 = vpop.f32.mrb[68].mxu1 }
 0x3c1   : > { %v3899_v11 = vpop.f32.mrb[69].mxu1 }
 0x3c2   : > { %v2936_v30 = vadd.f32 %v2922_v57, %v2730_v12  ;;  %v3900_v27 = vadd.f32 %v3899_v11, %v3898_v20 }
 0x3c4   : > { %2940 = vst.msk [vmem:[#allocation2 + $0x8] sm:$0xff] %vm1077_vm1, %v2936_v30  ;;  %v2927_v13 = vadd.f32 %v3900_v27, %v3856_v21  ;;  %v3901_v28 = vpop.f32.mrb[70].mxu1 }
 0x3c5   : > { %v3902_v14 = vpop.f32.mrb[71].mxu1 }
 0x3c6   : > { %v2937_v49 = vadd.f32 %v2927_v13, %v2731_v16  ;;  %v3903_v7 = vadd.f32 %v3902_v14, %v3901_v28  ;;  %2946 = sbr.rel (%p3661_p6) target bundleno = 1581 (0x62d), region = 88 }
 0x3c7   : > { %v5628_v59 = vld [vmem:[#allocation2] sm:$0xff] (!%p3661_p6) }
 0x3c8   : > { %2941 = vst.msk [vmem:[#allocation2 + $0x10] sm:$0xff] %vm1077_vm1, %v2937_v49  ;;  %v2932_v40 = vadd.f32 %v3903_v7, %v3859_v54  ;;  %4136 = vmatprep.mubr.msk.f32.mxu0 (!%p3661_p6), %vm1077_vm1, %v5628_v59 }
 0x3ca   : > { %v2938_v60 = vadd.f32 %v2932_v40, %v2732_v33 }
 0x3cb   : > { %v5632_v52 = vld [vmem:[#allocation2 + $0x8] sm:$0xff] (!%p3661_p6) }
 0x3cc   : > { %2942 = vst.msk [vmem:[#allocation2 + $0x18] sm:$0xff] %vm1077_vm1, %v2938_v60  ;;  %4137 = vmatmul.mubr.msk.f32.vlgmr.msra.gmra.mrb[0].mxu0 (!%p3661_p6), %vm1077_vm1, %v5632_v52  ;;  %v3667_v60 = vld [vmem:[%s5737_s9] ss:$0 sm:$0xff] (!%p3661_p6) }
 0x3cf   : > { %v5634_v3 = vld [vmem:[#allocation2 + $0x10] sm:$0xff] }
 0x3d0   : > { %4139 = vmatprep.mubr.msk.f32.mxu0 %vm1077_vm1, %v5634_v3 }
 0x3d3   : > { %v5640_v45 = vld [vmem:[#allocation2 + $0x18] sm:$0xff] }
 0x3d4   : > { %4140 = vmatmul.mubr.msk.f32.gmra.mrb[2].mxu0 %vm1077_vm1, %v5640_v45 }
 0x49f   : > { %v4138_v35 = vpop.f32.mrb[0].mxu0 }
 0x4a0   : > { %v3046_v63 = vadd.f32 %v4138_v35, %v3662_v38  ;;  %v3040_v32 = vpop.f32.mrb[1].mxu0 }
 0x4a1   : > { %v3041_v15 = vadd.f32 %v3662_v38, %v3040_v32 }
 0x4a2   : > { %v3062_v8 = vsel %vm1077_vm1, %v3046_v63, 0.0 }
 0x4a3   : > { %v3061_v41 = vsel %vm1077_vm1, %v3041_v15, 0.0 }
 0x4a4   : > { %v3063_v9 = vadd.f32 %v3062_v8, %v3061_v41 }
 0x4a7   : > { %v4141_v48 = vpop.f32.mrb[2].mxu0 }
 0x4a8   : > { %v3050_v18 = vpop.f32.mrb[3].mxu0  ;;  %v3056_v36 = vadd.f32 %v4141_v48, %v3662_v38 }
 0x4a9   : > { %v3051_v5 = vadd.f32 %v3662_v38, %v3050_v18 }
 0x4aa   : > { %v3066_v37 = vsel %vm1077_vm1, %v3056_v36, 0.0 }
 0x4ab   : > { %v3064_v62 = vsel %vm1077_vm1, %v3051_v5, 0.0 }
 0x4ac   : > { %v3065_v43 = vadd.f32 %v3064_v62, %v3063_v9 }
 0x4ae   : > { %v3067_v56 = vadd.f32 %v3066_v37, %v3065_v43 }
 0x4b0   : > { %v3068_v10 = vrot.slane %v3067_v56, 4 }
 0x4b2   : > { %v3069_v2 = vadd.f32 %v3068_v10, %v3067_v56 }
 0x4b4   : > { %v3070_v17 = vrot.slane %v3069_v2, 2 }
 0x4b6   : > { %v3071_v24 = vadd.f32 %v3070_v17, %v3069_v2 }
 0x4b8   : > { %v3072_v21 = vrot.slane %v3071_v24, 1 }
 0x4ba   : > { %v3073_v39 = vadd.f32 %v3072_v21, %v3071_v24 }
 0x4bc   : > { %v3074_v53 = vmul.f32 0.03125, %v3073_v39  ;;  %v3669_v39 = vld [vmem:[%s5740_s12] ss:$0 sm:$0xff] }
 0x4be   : > { %v3075_v54 = vsub.f32 %v3041_v15, %v3074_v53  ;;  %v3076_v61 = vsub.f32 %v3046_v63, %v3074_v53  ;;  %v3077_v58 = vsub.f32 %v3051_v5, %v3074_v53  ;;  %v3078_v31 = vsub.f32 %v3056_v36, %v3074_v53 }
 0x4c0   : > { %v3079_v22 = vmul.f32 %v3075_v54, %v3075_v54  ;;  %v3080_v50 = vmul.f32 %v3076_v61, %v3076_v61  ;;  %v3081_v34 = vmul.f32 %v3077_v58, %v3077_v58  ;;  %v3082_v19 = vmul.f32 %v3078_v31, %v3078_v31 }
 0x4c2   : > { %v3083_v6 = vsel %vm1077_vm1, %v3079_v22, 0.0  ;;  %v3084_v0 = vsel %vm1077_vm1, %v3080_v50, 0.0  ;;  %v3086_v57 = vsel %vm1077_vm1, %v3081_v34, 0.0  ;;  %v3088_v11 = vsel %vm1077_vm1, %v3082_v19, 0.0 }
 0x4c3   : > { %v3085_v12 = vadd.f32 %v3084_v0, %v3083_v6 }
 0x4c5   : > { %v3087_v20 = vadd.f32 %v3086_v57, %v3085_v12 }
 0x4c7   : > { %v3089_v30 = vadd.f32 %v3088_v11, %v3087_v20 }
 0x4c9   : > { %v3090_v27 = vrot.slane %v3089_v30, 4 }
 0x4cb   : > { %v3091_v16 = vadd.f32 %v3090_v27, %v3089_v30 }
 0x4cd   : > { %v3092_v13 = vrot.slane %v3091_v16, 2 }
 0x4cf   : > { %v3093_v28 = vadd.f32 %v3092_v13, %v3091_v16 }
 0x4d1   : > { %v3094_v14 = vrot.slane %v3093_v28, 1 }
 0x4d3   : > { %v3095_v49 = vadd.f32 %v3094_v14, %v3093_v28 }
 0x4d5   : > { %v3096_v7 = vmul.f32 0.03125, %v3095_v49 }
 0x4d7   : > { %v3097_v33 = vadd.f32 1e-05, %v3096_v7 }
 0x4d9   : > { %4403 = vrsqrt.f32 %v3097_v33 }
 0x4e3   : > { %v4404_v40 = vpop.eup %4403 }
 0x4e4   : > { %v3101_v1 = vmul.f32 %v4404_v40, %v3077_v58  ;;  %v3099_v42 = vmul.f32 %v4404_v40, %v3075_v54  ;;  %v3100_v46 = vmul.f32 %v4404_v40, %v3076_v61  ;;  %v3102_v51 = vmul.f32 %v4404_v40, %v3078_v31 }
 0x4e6   : > { %v3111_v25 = vmul.f32 %v3667_v60, %v3101_v1  ;;  %v3109_v47 = vmul.f32 %v3667_v60, %v3099_v42  ;;  %v3110_v44 = vmul.f32 %v3667_v60, %v3100_v46  ;;  %v3112_v4 = vmul.f32 %v3667_v60, %v3102_v51 }
 0x4e8   : > { %v3119_v26 = vadd.f32 %v3668_v55, %v3109_v47  ;;  %v3120_v29 = vadd.f32 %v3668_v55, %v3110_v44  ;;  %v3121_v23 = vadd.f32 %v3668_v55, %v3111_v25  ;;  %v3122_v38 = vadd.f32 %v3668_v55, %v3112_v4 }
 0x4ea   : > { %v3127_v35 = vmul.f32 0.70710677, %v3119_v26  ;;  %v3128_v63 = vmul.f32 0.70710677, %v3120_v29  ;;  %v3129_v32 = vmul.f32 0.70710677, %v3121_v23 }
 0x4eb   : > { %v3130_v15 = vmul.f32 0.70710677, %v3122_v38  ;;  %v3123_v48 = vmul.f32 0.5, %v3119_v26  ;;  %v3124_v36 = vmul.f32 0.5, %v3120_v29  ;;  %v3125_v37 = vmul.f32 0.5, %v3121_v23 }
 0x4ec   : > { %4405 = verf.f32 %v3127_v35  ;;  %v3126_v24 = vmul.f32 0.5, %v3122_v38 }
 0x4ed   : > { %4407 = verf.f32 %v3128_v63 }
 0x4ee   : > { %4409 = verf.f32 %v3129_v32 }
 0x4ef   : > { %4411 = verf.f32 %v3130_v15 }
 0x4f6   : > { %v4406_v8 = vpop.eup %4405 }
 0x4f7   : > { %v4408_v41 = vpop.eup %4407  ;;  %v3135_v9 = vadd.f32 1.0, %v4406_v8 }
 0x4f8   : > { %v4410_v18 = vpop.eup %4409  ;;  %v3136_v5 = vadd.f32 1.0, %v4408_v41 }
 0x4f9   : > { %v4412_v62 = vpop.eup %4411  ;;  %v3139_v43 = vmul.f32 %v3135_v9, %v3123_v48  ;;  %v3137_v56 = vadd.f32 1.0, %v4410_v18  ;;  %v3674_v9 = vld [vmem:[%s5741_s13] ss:$0 sm:$0xff] }
 0x4fa   : > { %v3140_v10 = vmul.f32 %v3136_v5, %v3124_v36  ;;  %v3138_v2 = vadd.f32 1.0, %v4412_v62 }
 0x4fb   : > { %4150 = vmatprep.mubr.msk.f32.mxu1 %vm1077_vm1, %v3139_v43  ;;  %v3141_v17 = vmul.f32 %v3137_v56, %v3125_v37  ;;  %v3675_v43 = vld [vmem:[%s5742_s14] ss:$0 sm:$0xff] }
 0x4fc   : > { %4151 = vmatmul.mubr.msk.f32.vlgmr.msra.gmra.mrb[0].mxu1 %vm1077_vm1, %v3140_v10  ;;  %v3142_v21 = vmul.f32 %v3138_v2, %v3126_v24 }
 0x4fd   : > { %4153 = vmatprep.mubr.msk.f32.mxu1 %vm1077_vm1, %v3141_v17 }
 0x500   : > { %4154 = vmatmul.mubr.msk.f32.gmra.mrb[2].mxu1 %vm1077_vm1, %v3142_v21 }
 0x5cf   : > { %v4152_v53 = vpop.f32.mrb[0].mxu1 }
 0x5d0   : > { %v3238_v54 = vadd.f32 %v4152_v53, %v3669_v39  ;;  %v3232_v61 = vpop.f32.mrb[1].mxu1 }
 0x5d1   : > { %v3233_v58 = vadd.f32 %v3669_v39, %v3232_v61 }
 0x5d2   : > { %v3254_v31 = vsel %vm1077_vm1, %v3238_v54, 0.0 }
 0x5d3   : > { %v3253_v22 = vsel %vm1077_vm1, %v3233_v58, 0.0  ;;  %v4155_v50 = vpop.f32.mrb[2].mxu1 }
 0x5d4   : > { %v3255_v34 = vadd.f32 %v3254_v31, %v3253_v22  ;;  %v3242_v19 = vpop.f32.mrb[3].mxu1  ;;  %v3248_v6 = vadd.f32 %v4155_v50, %v3669_v39 }
 0x5d5   : > { %v3243_v0 = vadd.f32 %v3669_v39, %v3242_v19 }
 0x5d6   : > { %v3258_v20 = vsel %vm1077_vm1, %v3248_v6, 0.0 }
 0x5d7   : > { %v3256_v12 = vsel %vm1077_vm1, %v3243_v0, 0.0 }
 0x5d8   : > { %v3257_v57 = vadd.f32 %v3256_v12, %v3255_v34 }
 0x5da   : > { %v3259_v11 = vadd.f32 %v3258_v20, %v3257_v57 }
 0x5dc   : > { %v3260_v30 = vrot.slane %v3259_v11, 4 }
 0x5de   : > { %v3261_v27 = vadd.f32 %v3260_v30, %v3259_v11 }
 0x5e0   : > { %v3262_v16 = vrot.slane %v3261_v27, 2 }
 0x5e2   : > { %v3263_v13 = vadd.f32 %v3262_v16, %v3261_v27 }
 0x5e4   : > { %v3264_v28 = vrot.slane %v3263_v13, 1 }
 0x5e6   : > { %v3265_v14 = vadd.f32 %v3264_v28, %v3263_v13 }
 0x5e8   : > { %v3266_v49 = vmul.f32 0.03125, %v3265_v14 }
 0x5ea   : > { %v3267_v7 = vsub.f32 %v3233_v58, %v3266_v49  ;;  %v3268_v33 = vsub.f32 %v3238_v54, %v3266_v49  ;;  %v3269_v40 = vsub.f32 %v3243_v0, %v3266_v49  ;;  %v3270_v60 = vsub.f32 %v3248_v6, %v3266_v49 }
 0x5ec   : > { %v3271_v1 = vmul.f32 %v3267_v7, %v3267_v7  ;;  %v3272_v42 = vmul.f32 %v3268_v33, %v3268_v33  ;;  %v3273_v46 = vmul.f32 %v3269_v40, %v3269_v40  ;;  %v3274_v51 = vmul.f32 %v3270_v60, %v3270_v60 }
 0x5ee   : > { %v3275_v55 = vsel %vm1077_vm1, %v3271_v1, 0.0  ;;  %v3276_v25 = vsel %vm1077_vm1, %v3272_v42, 0.0  ;;  %v3278_v44 = vsel %vm1077_vm1, %v3273_v46, 0.0  ;;  %v3280_v26 = vsel %vm1077_vm1, %v3274_v51, 0.0 }
 0x5ef   : > { %v3277_v47 = vadd.f32 %v3276_v25, %v3275_v55 }
 0x5f1   : > { %v3279_v4 = vadd.f32 %v3278_v44, %v3277_v47 }
 0x5f3   : > { %v3281_v29 = vadd.f32 %v3280_v26, %v3279_v4 }
 0x5f5   : > { %v3282_v23 = vrot.slane %v3281_v29, 4 }
 0x5f7   : > { %v3283_v38 = vadd.f32 %v3282_v23, %v3281_v29 }
 0x5f9   : > { %v3284_v35 = vrot.slane %v3283_v38, 2 }
 0x5fb   : > { %v3285_v63 = vadd.f32 %v3284_v35, %v3283_v38 }
 0x5fd   : > { %v3286_v32 = vrot.slane %v3285_v63, 1 }
 0x5ff   : > { %v3287_v15 = vadd.f32 %v3286_v32, %v3285_v63 }
 0x601   : > { %v3288_v8 = vmul.f32 0.03125, %v3287_v15 }
 0x603   : > { %v3289_v41 = vadd.f32 1e-05, %v3288_v8 }
 0x605   : > { %4413 = vrsqrt.f32 %v3289_v41 }
 0x60f   : > { %v4414_v48 = vpop.eup %4413 }
 0x610   : > { %v3291_v18 = vmul.f32 %v4414_v48, %v3267_v7  ;;  %v3292_v36 = vmul.f32 %v4414_v48, %v3268_v33  ;;  %v3293_v5 = vmul.f32 %v4414_v48, %v3269_v40  ;;  %v3294_v62 = vmul.f32 %v4414_v48, %v3270_v60 }
 0x612   : > { %v3301_v37 = vmul.f32 %v3674_v9, %v3291_v18  ;;  %v3302_v56 = vmul.f32 %v3674_v9, %v3292_v36  ;;  %v3303_v10 = vmul.f32 %v3674_v9, %v3293_v5  ;;  %v3304_v2 = vmul.f32 %v3674_v9, %v3294_v62 }
 0x614   : > { %v3311_v17 = vadd.f32 %v3675_v43, %v3301_v37  ;;  %v3312_v24 = vadd.f32 %v3675_v43, %v3302_v56  ;;  %v3313_v21 = vadd.f32 %v3675_v43, %v3303_v10  ;;  %v3314_v39 = vadd.f32 %v3675_v43, %v3304_v2 }
 0x616   : > { %v3319_v53 = vmul.f32 0.70710677, %v3311_v17  ;;  %v3320_v54 = vmul.f32 0.70710677, %v3312_v24  ;;  %v3321_v61 = vmul.f32 0.70710677, %v3313_v21 }
 0x617   : > { %v3322_v58 = vmul.f32 0.70710677, %v3314_v39  ;;  %v3315_v50 = vmul.f32 0.5, %v3311_v17  ;;  %v3316_v6 = vmul.f32 0.5, %v3312_v24  ;;  %v3317_v57 = vmul.f32 0.5, %v3313_v21 }
 0x618   : > { %4415 = verf.f32 %v3319_v53  ;;  %v3318_v30 = vmul.f32 0.5, %v3314_v39 }
 0x619   : > { %4417 = verf.f32 %v3320_v54 }
 0x61a   : > { %4419 = verf.f32 %v3321_v61 }
 0x61b   : > { %4421 = verf.f32 %v3322_v58 }
 0x622   : > { %v4416_v31 = vpop.eup %4415 }
 0x623   : > { %v4418_v22 = vpop.eup %4417  ;;  %v3327_v34 = vadd.f32 1.0, %v4416_v31 }
 0x624   : > { %v4420_v19 = vpop.eup %4419  ;;  %v3328_v0 = vadd.f32 1.0, %v4418_v22 }
 0x625   : > { %v4422_v12 = vpop.eup %4421  ;;  %v3329_v20 = vadd.f32 1.0, %v4420_v19  ;;  %v3331_v11 = vmul.f32 %v3327_v34, %v3315_v50 }
 0x626   : > { %v3330_v27 = vadd.f32 1.0, %v4422_v12  ;;  %v3332_v16 = vmul.f32 %v3328_v0, %v3316_v6 }
 0x627   : > { %v3333_v13 = vmul.f32 %v3329_v20, %v3317_v57  ;;  %v3335_v28 = vadd.f32 %v3331_v11, %v5628_v59 }
 0x628   : > { %v3334_v14 = vmul.f32 %v3330_v27, %v3318_v30  ;;  %v3336_v49 = vadd.f32 %v3332_v16, %v5632_v52 }
 0x629   : > { %v3337_v7 = vadd.f32 %v3333_v13, %v5634_v3  ;;  %3339 = vst.msk [vmem:[#allocation2] sm:$0xff] %vm1077_vm1, %v3335_v28 }
 0x62a   : > { %v3338_v33 = vadd.f32 %v3334_v14, %v5640_v45  ;;  %3340 = vst.msk [vmem:[#allocation2 + $0x8] sm:$0xff] %vm1077_vm1, %v3336_v49 }
 0x62b   : > { %3341 = vst.msk [vmem:[#allocation2 + $0x10] sm:$0xff] %vm1077_vm1, %v3337_v7 }
 0x62c   : > { %3342 = vst.msk [vmem:[#allocation2 + $0x18] sm:$0xff] %vm1077_vm1, %v3338_v33 }
 0x62d PF: > { %p4256_p7 = scmp.eq.s32.totalorder %s4553_s19, 2  ;;  %s4464_s21 = smov [#allocation2]  }
 0x62e   : > { %s3349_s28 = sshll.u32 %s4464_s21, 4  ;;  %s3350_s28 = int_to_ptr.vmem [resolvable:$true] %s3349_s28 }
 0x62f   : > { %s4423_s15 = scalar_lea.vmem %s3350_s28, 512  ;;  %p4430_p11 = scmp.lt.s32.totalorder %s3350_s28, %s3350_s28 }
 0x630   : > { %p4424_p8 = scmp.ne.s32.totalorder %s3350_s28, %s4423_s15  ;;  %p4431_p12 = scmp.lt.s32.totalorder %s4423_s15, %s4423_s15 }
 0x632   : > { %p4425_p9 = pnand %p4424_p8, %p4256_p7  ;;  %p4432_p13 = por %p4431_p12, %p4430_p11 }
 0x634   : > { %p4426_p10 = pneg %p4425_p9 }
 0x636   : > { %p4433_p0 = pnand %p4432_p13, %p4426_p10 }
 0x638   : > { %4436 = shalt.err (!%p4433_p0)
}
 0x639   : > { %s5748_s25 = sld [smem:[#allocation6_spill]] }
 0x63f   : > { %s4437_s30 = scalar_lea.hbm %s5748_s25, 512 }
 0x640   : > { %p4438_p1 = scmp.ne.s32.totalorder %s5748_s25, %s4437_s30  ;;  %p4443_p4 = scmp.lt.u32.totalorder %s4437_s30, %s5748_s25 }
 0x642   : > { %p4439_p2 = pnand %p4438_p1, %p4256_p7 }
 0x644   : > { %p4440_p3 = pneg %p4439_p2 }
 0x646   : > { %p4445_p5 = pnand %p4443_p4, %p4440_p3 }
 0x648   : > { %4448 = shalt.err (!%p4445_p5)
}
 0x649   : > { %s4465_s26 = smov 128   ;;  %s4466_s27 = smov 8  }
 0x64a   : > { %4253 = dma.vmem_to_hbm [thread:$0]  (%p4256_p7), %s3350_s28, 512, %s5748_s25, [#allocation3], %s4465_s26, %s4465_s26, %s4466_s27  }
 0x64b   : > { %4454 = dma.done.wait (%p4256_p7), [#allocation3], 512  }
 0x64c   : > { %4456 = vsyncadd (%p4256_p7), [#allocation3], 4294966784 }
 0x64d PF: > { %s5749_s21 = sld [smem:[#allocation5_spill]] }
 0x653   : > { %s26_s18 = sadd.s32 1, %s5749_s21  }
 0x654   : > { %p23_p6 = scmp.ge.s32.totalorder %s26_s18, 5  }
 0x656   :  { %25 = sbr.rel (!%p23_p6) target bundleno = 3 (0x3), region = 124 }
 0x65d   :  { %3365 = vsyncpa [#allocation3], 1 }
 0x65e   :  { %3367 = vsyncpa [#allocation3 + $0x1], 1 }

</bundles_post_ra>
